<compile_context>
chip_gen: v5e
topology: v5e:2x2
jax: 0.10.0
libtpu: 0.0.40
codegen_flags: <defaults>
</compile_context>

<pallas_src>
import math

import jax
import jax.numpy as jnp
from jax.experimental import pallas as pl
from jax.experimental.pallas import tpu as pltpu

# ---- NanoDecoderConfig (small, TPU-friendly) ----
VOCAB = 128
HIDDEN = 32
NUM_HEADS = 4
HEAD_DIM = HIDDEN // NUM_HEADS
INTER = 64
NUM_LAYERS = 2
BATCH = 2
SEQ = 8
TOKENS = BATCH * SEQ
Z = BATCH * NUM_HEADS
ATTN_SCALE = 1.0 / math.sqrt(HEAD_DIM)
PARAMS_PER_LAYER = 10

PADDED = 128                     # every Linear slab padded to (128 in, 128 out)
N_LIN = NUM_LAYERS * 5 + 1       # 5 linears per layer + tied lm_head = 11
LM_SLAB = NUM_LAYERS * 5         # 10
EMB_SLAB = N_LIN                 # 11 : (VOCAB, HIDDEN) embedding, lane padded
BIAS_SLAB = N_LIN + 1            # 12 : row i = bias of linear slab i
N_SLABS = N_LIN + 2              # 13


# ---------------- host-side weight packing ----------------
def pack_params(emb, lm_b, layer_params):
    """Pack all weights into one (N_SLABS, 128, 128) f32 buffer.

    Slabs 0..9 : per-layer linears, stored pre-transposed (Din, Dout) and
                 zero padded.  q rows / q bias of the qkv slab are pre-scaled
                 by ATTN_SCALE.
    Slab 10    : tied lm_head (emb.T, zero padded).
    Slab 11    : embedding table (VOCAB, HIDDEN) zero padded (one-hot matmul).
    Slab 12    : biases, row i = bias of linear slab i (zero padded).
    """
    wpack = jnp.zeros((N_SLABS, PADDED, PADDED), jnp.float32)

    def set_lin(wpack, idx, w, b):           # w: (Dout, Din) torch-style
        dout, din = w.shape
        wpack = wpack.at[idx, :din, :dout].set(w.T)
        wpack = wpack.at[BIAS_SLAB, idx, :dout].set(jnp.reshape(b, (-1,)))
        return wpack

    for layer in range(NUM_LAYERS):
        (ip_w, ip_b, qkv_w, qkv_b, o_w, o_b,
         fc1_w, fc1_b, fc2_w, fc2_b) = layer_params[
            layer * PARAMS_PER_LAYER:(layer + 1) * PARAMS_PER_LAYER]
        # fold attention scale into the q projection
        qkv_w_s = qkv_w.at[:HIDDEN, :].multiply(ATTN_SCALE)
        qkv_b_s = qkv_b.at[:, :HIDDEN].multiply(ATTN_SCALE)
        base = layer * 5
        wpack = set_lin(wpack, base + 0, ip_w, ip_b)
        wpack = set_lin(wpack, base + 1, qkv_w_s, qkv_b_s)
        wpack = set_lin(wpack, base + 2, o_w, o_b)
        wpack = set_lin(wpack, base + 3, fc1_w, fc1_b)
        wpack = set_lin(wpack, base + 4, fc2_w, fc2_b)

    # tied lm_head: weight == embedding
    wpack = set_lin(wpack, LM_SLAB, emb, lm_b)
    # embedding slab for the one-hot gather matmul
    wpack = wpack.at[EMB_SLAB, :VOCAB, :HIDDEN].set(emb)
    return wpack


# ---------------- the fused kernel ----------------
def nano_kernel(ids_ref, w_ref, out_ref):
    # ----- embedding lookup as one one-hot MXU matmul -----
    ids = ids_ref[...]                                            # (T, 1) int32
    lane = jax.lax.broadcasted_iota(jnp.int32, (TOKENS, PADDED), 1)
    one_hot = (ids == lane).astype(jnp.float32)                   # (T, 128)
    x = jnp.dot(one_hot, w_ref[EMB_SLAB],
                preferred_element_type=jnp.float32)               # (T, 128)

    # ----- hoisted constants -----
    biases = w_ref[BIAS_SLAB, 0:16, :]                            # (16, 128)
    qi = jax.lax.broadcasted_iota(jnp.int32, (Z, SEQ, SEQ), 1)
    ki = jax.lax.broadcasted_iota(jnp.int32, (Z, SEQ, SEQ), 2)
    mask = jnp.where(qi >= ki, 0.0, -1e30).astype(jnp.float32)    # additive

    def lin(xx, idx, k_in=PADDED):
        # xx: (T, k_in); slab rows 0:k_in = W.T (zero padded); bias in slab 12.
        w = w_ref[idx, 0:k_in, :]                                 # (k_in, 128)
        return (jnp.dot(xx, w, preferred_element_type=jnp.float32)
                + biases[idx:idx + 1, :])

    def heads(mat2d):
        # (T, HIDDEN) -> (Z, SEQ, HEAD_DIM), z = head * BATCH + batch.
        parts = [mat2d[:, h * HEAD_DIM:(h + 1) * HEAD_DIM]
                 for h in range(NUM_HEADS)]                       # 4 x (T, 8)
        return jnp.stack(parts, axis=0).reshape(Z, SEQ, HEAD_DIM)

    for layer in range(NUM_LAYERS):
        base = layer * 5

        # ----- CausalSelfAttention -----
        h = lin(x, base + 0)                                      # input_proj
        qkv = lin(h, base + 1)                                    # cols 0:96 valid
        qh = heads(qkv[:, 0:HIDDEN])                              # pre-scaled q
        kh = heads(qkv[:, HIDDEN:2 * HIDDEN])
        vh = heads(qkv[:, 2 * HIDDEN:3 * HIDDEN])
        s = jnp.einsum('zqd,zkd->zqk', qh, kh,
                       preferred_element_type=jnp.float32) + mask
        m = jnp.max(s, axis=-1, keepdims=True)
        e = jnp.exp(s - m)
        p = e / jnp.sum(e, axis=-1, keepdims=True)
        c = jnp.einsum('zqk,zkd->zqd', p, vh,
                       preferred_element_type=jnp.float32)        # (Z, S, HD)
        c = c.reshape(NUM_HEADS, TOKENS, HEAD_DIM)
        ctx = jnp.concatenate([c[hh] for hh in range(NUM_HEADS)],
                              axis=-1)                            # (T, HIDDEN)
        x = lin(ctx, base + 2, k_in=HIDDEN)                       # o_proj

        # ----- MLP with SwiGLU -----
        hm = lin(x, base + 3)                                     # fc_1 (T, 128)
        act = jax.nn.silu(hm[:, INTER:2 * INTER]) * hm[:, 0:INTER]
        x = lin(act, base + 4, k_in=INTER)                        # fc_2

    # ----- tied lm_head, lane-dense (T, 128) store -----
    out_ref[...] = lin(x, LM_SLAB)


def nano_forward(input_ids, wpack):
    ids2d = input_ids.reshape(TOKENS, 1).astype(jnp.int32)
    vmem = pl.BlockSpec(memory_space=pltpu.MemorySpace.VMEM)
    logits2d = pl.pallas_call(
        nano_kernel,
        out_shape=jax.ShapeDtypeStruct((TOKENS, VOCAB), jnp.float32),
        in_specs=[vmem, vmem],
        out_specs=vmem,
    )(ids2d, wpack)
    return logits2d.reshape(BATCH, SEQ, VOCAB)


# ---------------- deterministic parameter init ----------------
def init_params(key):
    def normal(k, shape, fan_in):
        return jax.random.normal(k, shape, jnp.float32) / math.sqrt(fan_in)

    k_emb, k_lmb, k_layers = jax.random.split(key, 3)
    emb = jax.random.normal(k_emb, (VOCAB, HIDDEN), jnp.float32) * 0.05
    lm_b = jax.random.normal(k_lmb, (1, VOCAB), jnp.float32) * 0.02

    layer_params = []
    for layer in range(NUM_LAYERS):
        lk = jax.random.fold_in(k_layers, layer)
        ks = jax.random.split(lk, 10)
        ip_w = normal(ks[0], (HIDDEN, HIDDEN), HIDDEN)
        ip_b = normal(ks[1], (1, HIDDEN), HIDDEN)
        qkv_w = normal(ks[2], (3 * HIDDEN, HIDDEN), HIDDEN)
        qkv_b = normal(ks[3], (1, 3 * HIDDEN), HIDDEN)
        o_w = normal(ks[4], (HIDDEN, HIDDEN), HIDDEN)
        o_b = normal(ks[5], (1, HIDDEN), HIDDEN)
        fc1_w = normal(ks[6], (2 * INTER, HIDDEN), HIDDEN)
        fc1_b = normal(ks[7], (1, 2 * INTER), HIDDEN)
        fc2_w = normal(ks[8], (HIDDEN, INTER), INTER)
        fc2_b = normal(ks[9], (1, HIDDEN), INTER)
        layer_params += [ip_w, ip_b, qkv_w, qkv_b, o_w, o_b,
                         fc1_w, fc1_b, fc2_w, fc2_b]
    return emb, lm_b, layer_params


# ---------------- pure-JAX reference for verification ----------------
def reference_forward(input_ids, emb, lm_b, layer_params):
    x = emb[input_ids]                                   # (B, S, H)
    B, S, H = x.shape
    causal = jnp.tril(jnp.ones((S, S), jnp.bool_))
    for layer in range(NUM_LAYERS):
        (ip_w, ip_b, qkv_w, qkv_b, o_w, o_b,
         fc1_w, fc1_b, fc2_w, fc2_b) = layer_params[
            layer * PARAMS_PER_LAYER:(layer + 1) * PARAMS_PER_LAYER]
        h = x @ ip_w.T + ip_b
        qkv = h @ qkv_w.T + qkv_b
        q, k, v = jnp.split(qkv, 3, axis=-1)
        q = q.reshape(B, S, NUM_HEADS, HEAD_DIM).transpose(0, 2, 1, 3)
        k = k.reshape(B, S, NUM_HEADS, HEAD_DIM).transpose(0, 2, 1, 3)
        v = v.reshape(B, S, NUM_HEADS, HEAD_DIM).transpose(0, 2, 1, 3)
        s = jnp.einsum('bnqd,bnkd->bnqk', q, k) * ATTN_SCALE
        s = jnp.where(causal[None, None], s, -1e30)
        p = jax.nn.softmax(s, axis=-1)
        ctx = jnp.einsum('bnqk,bnkd->bnqd', p, v)
        ctx = ctx.transpose(0, 2, 1, 3).reshape(B, S, H)
        x = ctx @ o_w.T + o_b
        hm = x @ fc1_w.T + fc1_b
        a, gate = hm[..., :INTER], hm[..., INTER:]
        x = (jax.nn.silu(gate) * a) @ fc2_w.T + fc2_b
    return x @ emb.T + lm_b


if __name__ == "__main__":
    key = jax.random.PRNGKey(0)
    k_ids, k_params = jax.random.split(key)
    input_ids = jax.random.randint(k_ids, (BATCH, SEQ), 0, VOCAB, dtype=jnp.int32)
    emb, lm_b, layer_params = init_params(k_params)
    wpack = pack_params(emb, lm_b, layer_params)         # one-time weight prep

    logits = nano_forward(input_ids, wpack)
    jax.block_until_ready(logits)

    ref = reference_forward(input_ids, emb, lm_b, layer_params)
    assert logits.shape == (BATCH, SEQ, VOCAB)
    assert jnp.allclose(logits, ref, rtol=1e-3, atol=1e-3), float(
        jnp.max(jnp.abs(logits - ref)))
    print("KERNEL_OK")
</pallas_src>

<mosaic_0001>
module attributes {stable_mosaic.version = 11 : i64} {
  func.func @nano_kernel(%arg0: memref<16x1xi32, #tpu.memory_space<vmem>>, %arg1: memref<13x128x128xf32, #tpu.memory_space<vmem>>, %arg2: memref<16x128xf32, #tpu.memory_space<vmem>>) attributes {dimension_semantics = [], scalar_prefetch = 0 : i64, scratch_operands = 0 : i64, tpu.core_type = #tpu.core_type<tc>} {
    %c0 = arith.constant 0 : index
    %c0_0 = arith.constant 0 : index
    %0 = vector.load %arg0[%c0, %c0_0] : memref<16x1xi32, #tpu.memory_space<vmem>>, vector<16x1xi32>
    %1 = tpu.iota {dimensions = array<i32: 1>} : vector<16x128xi32>
    %2 = vector.broadcast %0 : vector<16x1xi32> to vector<16x128xi32>
    %3 = arith.cmpi eq, %2, %1 : vector<16x128xi32>
    %4 = arith.extui %3 : vector<16x128xi1> to vector<16x128xi32>
    %5 = arith.sitofp %4 : vector<16x128xi32> to vector<16x128xf32>
    %c11 = arith.constant 11 : index
    %c0_1 = arith.constant 0 : index
    %c0_2 = arith.constant 0 : index
    %6 = vector.load %arg1[%c11, %c0_1, %c0_2] : memref<13x128x128xf32, #tpu.memory_space<vmem>>, vector<1x128x128xf32>
    %7 = vector.shape_cast %6 : vector<1x128x128xf32> to vector<128x128xf32>
    %cst = arith.constant dense<0.000000e+00> : vector<16x128xf32>
    %8 = tpu.matmul %5, %7, %cst {dimension_numbers = #tpu.dot_dimension_numbers<[1], [0], [0], [1], [0, 0, 1, 1], [], []>} : vector<16x128xf32>, vector<128x128xf32>, vector<16x128xf32> -> vector<16x128xf32>
    %c12 = arith.constant 12 : index
    %c0_3 = arith.constant 0 : index
    %c0_4 = arith.constant 0 : index
    %9 = vector.load %arg1[%c12, %c0_3, %c0_4] : memref<13x128x128xf32, #tpu.memory_space<vmem>>, vector<1x16x128xf32>
    %10 = vector.shape_cast %9 : vector<1x16x128xf32> to vector<16x128xf32>
    %11 = tpu.iota {dimensions = array<i32: 1>} : vector<8x8x8xi32>
    %12 = tpu.iota {dimensions = array<i32: 2>} : vector<8x8x8xi32>
    %13 = arith.cmpi sge, %11, %12 : vector<8x8x8xi32>
    %cst_5 = arith.constant 0.000000e+00 : f32
    %cst_6 = arith.constant -1.000000e+30 : f32
    %14 = vector.broadcast %cst_5 : f32 to vector<8x8x8xf32>
    %15 = vector.broadcast %cst_6 : f32 to vector<8x8x8xf32>
    %16 = arith.select %13, %14, %15 : vector<8x8x8xi1>, vector<8x8x8xf32>
    %c0_7 = arith.constant 0 : index
    %c0_8 = arith.constant 0 : index
    %c0_9 = arith.constant 0 : index
    %17 = vector.load %arg1[%c0_7, %c0_8, %c0_9] : memref<13x128x128xf32, #tpu.memory_space<vmem>>, vector<1x128x128xf32>
    %18 = vector.shape_cast %17 : vector<1x128x128xf32> to vector<128x128xf32>
    %cst_10 = arith.constant dense<0.000000e+00> : vector<16x128xf32>
    %19 = tpu.matmul %8, %18, %cst_10 {dimension_numbers = #tpu.dot_dimension_numbers<[1], [0], [0], [1], [0, 0, 1, 1], [], []>} : vector<16x128xf32>, vector<128x128xf32>, vector<16x128xf32> -> vector<16x128xf32>
    %20 = vector.extract_strided_slice %10 {offsets = [0, 0], sizes = [1, 128], strides = [1, 1]} : vector<16x128xf32> to vector<1x128xf32>
    %21 = vector.broadcast %20 : vector<1x128xf32> to vector<16x128xf32>
    %22 = arith.addf %19, %21 : vector<16x128xf32>
    %c1 = arith.constant 1 : index
    %c0_11 = arith.constant 0 : index
    %c0_12 = arith.constant 0 : index
    %23 = vector.load %arg1[%c1, %c0_11, %c0_12] : memref<13x128x128xf32, #tpu.memory_space<vmem>>, vector<1x128x128xf32>
    %24 = vector.shape_cast %23 : vector<1x128x128xf32> to vector<128x128xf32>
    %cst_13 = arith.constant dense<0.000000e+00> : vector<16x128xf32>
    %25 = tpu.matmul %22, %24, %cst_13 {dimension_numbers = #tpu.dot_dimension_numbers<[1], [0], [0], [1], [0, 0, 1, 1], [], []>} : vector<16x128xf32>, vector<128x128xf32>, vector<16x128xf32> -> vector<16x128xf32>
    %26 = vector.extract_strided_slice %10 {offsets = [1, 0], sizes = [1, 128], strides = [1, 1]} : vector<16x128xf32> to vector<1x128xf32>
    %27 = vector.broadcast %26 : vector<1x128xf32> to vector<16x128xf32>
    %28 = arith.addf %25, %27 : vector<16x128xf32>
    %29 = vector.extract_strided_slice %28 {offsets = [0, 0], sizes = [16, 32], strides = [1, 1]} : vector<16x128xf32> to vector<16x32xf32>
    %30 = vector.extract_strided_slice %29 {offsets = [0, 0], sizes = [16, 8], strides = [1, 1]} : vector<16x32xf32> to vector<16x8xf32>
    %31 = vector.extract_strided_slice %29 {offsets = [0, 8], sizes = [16, 8], strides = [1, 1]} : vector<16x32xf32> to vector<16x8xf32>
    %32 = vector.extract_strided_slice %29 {offsets = [0, 16], sizes = [16, 8], strides = [1, 1]} : vector<16x32xf32> to vector<16x8xf32>
    %33 = vector.extract_strided_slice %29 {offsets = [0, 24], sizes = [16, 8], strides = [1, 1]} : vector<16x32xf32> to vector<16x8xf32>
    %34 = vector.shape_cast %30 : vector<16x8xf32> to vector<1x16x8xf32>
    %35 = vector.shape_cast %31 : vector<16x8xf32> to vector<1x16x8xf32>
    %36 = vector.shape_cast %32 : vector<16x8xf32> to vector<1x16x8xf32>
    %37 = vector.shape_cast %33 : vector<16x8xf32> to vector<1x16x8xf32>
    %38 = tpu.concatenate %34, %35, %36, %37 in 0 : vector<1x16x8xf32>, vector<1x16x8xf32>, vector<1x16x8xf32>, vector<1x16x8xf32> -> vector<4x16x8xf32>
    %39 = vector.shape_cast %38 : vector<4x16x8xf32> to vector<8x8x8xf32>
    %40 = vector.extract_strided_slice %28 {offsets = [0, 32], sizes = [16, 32], strides = [1, 1]} : vector<16x128xf32> to vector<16x32xf32>
    %41 = vector.extract_strided_slice %40 {offsets = [0, 0], sizes = [16, 8], strides = [1, 1]} : vector<16x32xf32> to vector<16x8xf32>
    %42 = vector.extract_strided_slice %40 {offsets = [0, 8], sizes = [16, 8], strides = [1, 1]} : vector<16x32xf32> to vector<16x8xf32>
    %43 = vector.extract_strided_slice %40 {offsets = [0, 16], sizes = [16, 8], strides = [1, 1]} : vector<16x32xf32> to vector<16x8xf32>
    %44 = vector.extract_strided_slice %40 {offsets = [0, 24], sizes = [16, 8], strides = [1, 1]} : vector<16x32xf32> to vector<16x8xf32>
    %45 = vector.shape_cast %41 : vector<16x8xf32> to vector<1x16x8xf32>
    %46 = vector.shape_cast %42 : vector<16x8xf32> to vector<1x16x8xf32>
    %47 = vector.shape_cast %43 : vector<16x8xf32> to vector<1x16x8xf32>
    %48 = vector.shape_cast %44 : vector<16x8xf32> to vector<1x16x8xf32>
    %49 = tpu.concatenate %45, %46, %47, %48 in 0 : vector<1x16x8xf32>, vector<1x16x8xf32>, vector<1x16x8xf32>, vector<1x16x8xf32> -> vector<4x16x8xf32>
    %50 = vector.shape_cast %49 : vector<4x16x8xf32> to vector<8x8x8xf32>
    %51 = vector.extract_strided_slice %28 {offsets = [0, 64], sizes = [16, 32], strides = [1, 1]} : vector<16x128xf32> to vector<16x32xf32>
    %52 = vector.extract_strided_slice %51 {offsets = [0, 0], sizes = [16, 8], strides = [1, 1]} : vector<16x32xf32> to vector<16x8xf32>
    %53 = vector.extract_strided_slice %51 {offsets = [0, 8], sizes = [16, 8], strides = [1, 1]} : vector<16x32xf32> to vector<16x8xf32>
    %54 = vector.extract_strided_slice %51 {offsets = [0, 16], sizes = [16, 8], strides = [1, 1]} : vector<16x32xf32> to vector<16x8xf32>
    %55 = vector.extract_strided_slice %51 {offsets = [0, 24], sizes = [16, 8], strides = [1, 1]} : vector<16x32xf32> to vector<16x8xf32>
    %56 = vector.shape_cast %52 : vector<16x8xf32> to vector<1x16x8xf32>
    %57 = vector.shape_cast %53 : vector<16x8xf32> to vector<1x16x8xf32>
    %58 = vector.shape_cast %54 : vector<16x8xf32> to vector<1x16x8xf32>
    %59 = vector.shape_cast %55 : vector<16x8xf32> to vector<1x16x8xf32>
    %60 = tpu.concatenate %56, %57, %58, %59 in 0 : vector<1x16x8xf32>, vector<1x16x8xf32>, vector<1x16x8xf32>, vector<1x16x8xf32> -> vector<4x16x8xf32>
    %61 = vector.shape_cast %60 : vector<4x16x8xf32> to vector<8x8x8xf32>
    "tpu.trace_start"() <{level = 10 : i32, message = "zqd,zkd->zqk"}> : () -> ()
    %cst_14 = arith.constant dense<0.000000e+00> : vector<8x8x8xf32>
    %62 = tpu.matmul %39, %50, %cst_14 {dimension_numbers = #tpu.dot_dimension_numbers<[2], [2], [1], [1], [0, 0, 0, 1, 1, 1], [0], [0]>} : vector<8x8x8xf32>, vector<8x8x8xf32>, vector<8x8x8xf32> -> vector<8x8x8xf32>
    "tpu.trace_stop"() : () -> ()
    %63 = arith.addf %62, %16 : vector<8x8x8xf32>
    %cst_15 = arith.constant dense<0xFF800000> : vector<8x8xf32>
    %64 = vector.multi_reduction <maximumf>, %63, %cst_15 [2] : vector<8x8x8xf32> to vector<8x8xf32>
    %65 = vector.shape_cast %64 : vector<8x8xf32> to vector<8x8x1xf32>
    %66 = vector.broadcast %65 : vector<8x8x1xf32> to vector<8x8x8xf32>
    %67 = arith.subf %63, %66 : vector<8x8x8xf32>
    %68 = math.exp %67 : vector<8x8x8xf32>
    %cst_16 = arith.constant dense<0.000000e+00> : vector<8x8xf32>
    %69 = vector.multi_reduction <add>, %68, %cst_16 [2] : vector<8x8x8xf32> to vector<8x8xf32>
    %70 = vector.shape_cast %69 : vector<8x8xf32> to vector<8x8x1xf32>
    %71 = vector.broadcast %70 : vector<8x8x1xf32> to vector<8x8x8xf32>
    %72 = arith.divf %68, %71 : vector<8x8x8xf32>
    "tpu.trace_start"() <{level = 10 : i32, message = "zqk,zkd->zqd"}> : () -> ()
    %cst_17 = arith.constant dense<0.000000e+00> : vector<8x8x8xf32>
    %73 = tpu.matmul %72, %61, %cst_17 {dimension_numbers = #tpu.dot_dimension_numbers<[2], [1], [1], [2], [0, 0, 0, 1, 1, 2], [0], [0]>} : vector<8x8x8xf32>, vector<8x8x8xf32>, vector<8x8x8xf32> -> vector<8x8x8xf32>
    "tpu.trace_stop"() : () -> ()
    %74 = vector.shape_cast %73 : vector<8x8x8xf32> to vector<4x16x8xf32>
    %75 = vector.extract_strided_slice %74 {offsets = [0, 0, 0], sizes = [1, 16, 8], strides = [1, 1, 1]} : vector<4x16x8xf32> to vector<1x16x8xf32>
    %76 = vector.shape_cast %75 : vector<1x16x8xf32> to vector<16x8xf32>
    %77 = vector.extract_strided_slice %74 {offsets = [1, 0, 0], sizes = [1, 16, 8], strides = [1, 1, 1]} : vector<4x16x8xf32> to vector<1x16x8xf32>
    %78 = vector.shape_cast %77 : vector<1x16x8xf32> to vector<16x8xf32>
    %79 = vector.extract_strided_slice %74 {offsets = [2, 0, 0], sizes = [1, 16, 8], strides = [1, 1, 1]} : vector<4x16x8xf32> to vector<1x16x8xf32>
    %80 = vector.shape_cast %79 : vector<1x16x8xf32> to vector<16x8xf32>
    %81 = vector.extract_strided_slice %74 {offsets = [3, 0, 0], sizes = [1, 16, 8], strides = [1, 1, 1]} : vector<4x16x8xf32> to vector<1x16x8xf32>
    %82 = vector.shape_cast %81 : vector<1x16x8xf32> to vector<16x8xf32>
    %83 = tpu.concatenate %76, %78, %80, %82 in 1 : vector<16x8xf32>, vector<16x8xf32>, vector<16x8xf32>, vector<16x8xf32> -> vector<16x32xf32>
    %c2 = arith.constant 2 : index
    %c0_18 = arith.constant 0 : index
    %c0_19 = arith.constant 0 : index
    %84 = vector.load %arg1[%c2, %c0_18, %c0_19] : memref<13x128x128xf32, #tpu.memory_space<vmem>>, vector<1x32x128xf32>
    %85 = vector.shape_cast %84 : vector<1x32x128xf32> to vector<32x128xf32>
    %cst_20 = arith.constant dense<0.000000e+00> : vector<16x128xf32>
    %86 = tpu.matmul %83, %85, %cst_20 {dimension_numbers = #tpu.dot_dimension_numbers<[1], [0], [0], [1], [0, 0, 1, 1], [], []>} : vector<16x32xf32>, vector<32x128xf32>, vector<16x128xf32> -> vector<16x128xf32>
    %87 = vector.extract_strided_slice %10 {offsets = [2, 0], sizes = [1, 128], strides = [1, 1]} : vector<16x128xf32> to vector<1x128xf32>
    %88 = vector.broadcast %87 : vector<1x128xf32> to vector<16x128xf32>
    %89 = arith.addf %86, %88 : vector<16x128xf32>
    %c3 = arith.constant 3 : index
    %c0_21 = arith.constant 0 : index
    %c0_22 = arith.constant 0 : index
    %90 = vector.load %arg1[%c3, %c0_21, %c0_22] : memref<13x128x128xf32, #tpu.memory_space<vmem>>, vector<1x128x128xf32>
    %91 = vector.shape_cast %90 : vector<1x128x128xf32> to vector<128x128xf32>
    %cst_23 = arith.constant dense<0.000000e+00> : vector<16x128xf32>
    %92 = tpu.matmul %89, %91, %cst_23 {dimension_numbers = #tpu.dot_dimension_numbers<[1], [0], [0], [1], [0, 0, 1, 1], [], []>} : vector<16x128xf32>, vector<128x128xf32>, vector<16x128xf32> -> vector<16x128xf32>
    %93 = vector.extract_strided_slice %10 {offsets = [3, 0], sizes = [1, 128], strides = [1, 1]} : vector<16x128xf32> to vector<1x128xf32>
    %94 = vector.broadcast %93 : vector<1x128xf32> to vector<16x128xf32>
    %95 = arith.addf %92, %94 : vector<16x128xf32>
    %96 = vector.extract_strided_slice %95 {offsets = [0, 64], sizes = [16, 64], strides = [1, 1]} : vector<16x128xf32> to vector<16x64xf32>
    %97 = arith.negf %96 : vector<16x64xf32>
    %98 = math.exp %97 : vector<16x64xf32>
    %cst_24 = arith.constant 1.000000e+00 : f32
    %99 = vector.broadcast %cst_24 : f32 to vector<16x64xf32>
    %100 = arith.addf %99, %98 : vector<16x64xf32>
    %101 = arith.divf %99, %100 : vector<16x64xf32>
    %102 = arith.mulf %96, %101 : vector<16x64xf32>
    %103 = vector.extract_strided_slice %95 {offsets = [0, 0], sizes = [16, 64], strides = [1, 1]} : vector<16x128xf32> to vector<16x64xf32>
    %104 = arith.mulf %102, %103 : vector<16x64xf32>
    %c4 = arith.constant 4 : index
    %c0_25 = arith.constant 0 : index
    %c0_26 = arith.constant 0 : index
    %105 = vector.load %arg1[%c4, %c0_25, %c0_26] : memref<13x128x128xf32, #tpu.memory_space<vmem>>, vector<1x64x128xf32>
    %106 = vector.shape_cast %105 : vector<1x64x128xf32> to vector<64x128xf32>
    %cst_27 = arith.constant dense<0.000000e+00> : vector<16x128xf32>
    %107 = tpu.matmul %104, %106, %cst_27 {dimension_numbers = #tpu.dot_dimension_numbers<[1], [0], [0], [1], [0, 0, 1, 1], [], []>} : vector<16x64xf32>, vector<64x128xf32>, vector<16x128xf32> -> vector<16x128xf32>
    %108 = vector.extract_strided_slice %10 {offsets = [4, 0], sizes = [1, 128], strides = [1, 1]} : vector<16x128xf32> to vector<1x128xf32>
    %109 = vector.broadcast %108 : vector<1x128xf32> to vector<16x128xf32>
    %110 = arith.addf %107, %109 : vector<16x128xf32>
    %c5 = arith.constant 5 : index
    %c0_28 = arith.constant 0 : index
    %c0_29 = arith.constant 0 : index
    %111 = vector.load %arg1[%c5, %c0_28, %c0_29] : memref<13x128x128xf32, #tpu.memory_space<vmem>>, vector<1x128x128xf32>
    %112 = vector.shape_cast %111 : vector<1x128x128xf32> to vector<128x128xf32>
    %cst_30 = arith.constant dense<0.000000e+00> : vector<16x128xf32>
    %113 = tpu.matmul %110, %112, %cst_30 {dimension_numbers = #tpu.dot_dimension_numbers<[1], [0], [0], [1], [0, 0, 1, 1], [], []>} : vector<16x128xf32>, vector<128x128xf32>, vector<16x128xf32> -> vector<16x128xf32>
    %114 = vector.extract_strided_slice %10 {offsets = [5, 0], sizes = [1, 128], strides = [1, 1]} : vector<16x128xf32> to vector<1x128xf32>
    %115 = vector.broadcast %114 : vector<1x128xf32> to vector<16x128xf32>
    %116 = arith.addf %113, %115 : vector<16x128xf32>
    %c6 = arith.constant 6 : index
    %c0_31 = arith.constant 0 : index
    %c0_32 = arith.constant 0 : index
    %117 = vector.load %arg1[%c6, %c0_31, %c0_32] : memref<13x128x128xf32, #tpu.memory_space<vmem>>, vector<1x128x128xf32>
    %118 = vector.shape_cast %117 : vector<1x128x128xf32> to vector<128x128xf32>
    %cst_33 = arith.constant dense<0.000000e+00> : vector<16x128xf32>
    %119 = tpu.matmul %116, %118, %cst_33 {dimension_numbers = #tpu.dot_dimension_numbers<[1], [0], [0], [1], [0, 0, 1, 1], [], []>} : vector<16x128xf32>, vector<128x128xf32>, vector<16x128xf32> -> vector<16x128xf32>
    %120 = vector.extract_strided_slice %10 {offsets = [6, 0], sizes = [1, 128], strides = [1, 1]} : vector<16x128xf32> to vector<1x128xf32>
    %121 = vector.broadcast %120 : vector<1x128xf32> to vector<16x128xf32>
    %122 = arith.addf %119, %121 : vector<16x128xf32>
    %123 = vector.extract_strided_slice %122 {offsets = [0, 0], sizes = [16, 32], strides = [1, 1]} : vector<16x128xf32> to vector<16x32xf32>
    %124 = vector.extract_strided_slice %123 {offsets = [0, 0], sizes = [16, 8], strides = [1, 1]} : vector<16x32xf32> to vector<16x8xf32>
    %125 = vector.extract_strided_slice %123 {offsets = [0, 8], sizes = [16, 8], strides = [1, 1]} : vector<16x32xf32> to vector<16x8xf32>
    %126 = vector.extract_strided_slice %123 {offsets = [0, 16], sizes = [16, 8], strides = [1, 1]} : vector<16x32xf32> to vector<16x8xf32>
    %127 = vector.extract_strided_slice %123 {offsets = [0, 24], sizes = [16, 8], strides = [1, 1]} : vector<16x32xf32> to vector<16x8xf32>
    %128 = vector.shape_cast %124 : vector<16x8xf32> to vector<1x16x8xf32>
    %129 = vector.shape_cast %125 : vector<16x8xf32> to vector<1x16x8xf32>
    %130 = vector.shape_cast %126 : vector<16x8xf32> to vector<1x16x8xf32>
    %131 = vector.shape_cast %127 : vector<16x8xf32> to vector<1x16x8xf32>
    %132 = tpu.concatenate %128, %129, %130, %131 in 0 : vector<1x16x8xf32>, vector<1x16x8xf32>, vector<1x16x8xf32>, vector<1x16x8xf32> -> vector<4x16x8xf32>
    %133 = vector.shape_cast %132 : vector<4x16x8xf32> to vector<8x8x8xf32>
    %134 = vector.extract_strided_slice %122 {offsets = [0, 32], sizes = [16, 32], strides = [1, 1]} : vector<16x128xf32> to vector<16x32xf32>
    %135 = vector.extract_strided_slice %134 {offsets = [0, 0], sizes = [16, 8], strides = [1, 1]} : vector<16x32xf32> to vector<16x8xf32>
    %136 = vector.extract_strided_slice %134 {offsets = [0, 8], sizes = [16, 8], strides = [1, 1]} : vector<16x32xf32> to vector<16x8xf32>
    %137 = vector.extract_strided_slice %134 {offsets = [0, 16], sizes = [16, 8], strides = [1, 1]} : vector<16x32xf32> to vector<16x8xf32>
    %138 = vector.extract_strided_slice %134 {offsets = [0, 24], sizes = [16, 8], strides = [1, 1]} : vector<16x32xf32> to vector<16x8xf32>
    %139 = vector.shape_cast %135 : vector<16x8xf32> to vector<1x16x8xf32>
    %140 = vector.shape_cast %136 : vector<16x8xf32> to vector<1x16x8xf32>
    %141 = vector.shape_cast %137 : vector<16x8xf32> to vector<1x16x8xf32>
    %142 = vector.shape_cast %138 : vector<16x8xf32> to vector<1x16x8xf32>
    %143 = tpu.concatenate %139, %140, %141, %142 in 0 : vector<1x16x8xf32>, vector<1x16x8xf32>, vector<1x16x8xf32>, vector<1x16x8xf32> -> vector<4x16x8xf32>
    %144 = vector.shape_cast %143 : vector<4x16x8xf32> to vector<8x8x8xf32>
    %145 = vector.extract_strided_slice %122 {offsets = [0, 64], sizes = [16, 32], strides = [1, 1]} : vector<16x128xf32> to vector<16x32xf32>
    %146 = vector.extract_strided_slice %145 {offsets = [0, 0], sizes = [16, 8], strides = [1, 1]} : vector<16x32xf32> to vector<16x8xf32>
    %147 = vector.extract_strided_slice %145 {offsets = [0, 8], sizes = [16, 8], strides = [1, 1]} : vector<16x32xf32> to vector<16x8xf32>
    %148 = vector.extract_strided_slice %145 {offsets = [0, 16], sizes = [16, 8], strides = [1, 1]} : vector<16x32xf32> to vector<16x8xf32>
    %149 = vector.extract_strided_slice %145 {offsets = [0, 24], sizes = [16, 8], strides = [1, 1]} : vector<16x32xf32> to vector<16x8xf32>
    %150 = vector.shape_cast %146 : vector<16x8xf32> to vector<1x16x8xf32>
    %151 = vector.shape_cast %147 : vector<16x8xf32> to vector<1x16x8xf32>
    %152 = vector.shape_cast %148 : vector<16x8xf32> to vector<1x16x8xf32>
    %153 = vector.shape_cast %149 : vector<16x8xf32> to vector<1x16x8xf32>
    %154 = tpu.concatenate %150, %151, %152, %153 in 0 : vector<1x16x8xf32>, vector<1x16x8xf32>, vector<1x16x8xf32>, vector<1x16x8xf32> -> vector<4x16x8xf32>
    %155 = vector.shape_cast %154 : vector<4x16x8xf32> to vector<8x8x8xf32>
    "tpu.trace_start"() <{level = 10 : i32, message = "zqd,zkd->zqk"}> : () -> ()
    %cst_34 = arith.constant dense<0.000000e+00> : vector<8x8x8xf32>
    %156 = tpu.matmul %133, %144, %cst_34 {dimension_numbers = #tpu.dot_dimension_numbers<[2], [2], [1], [1], [0, 0, 0, 1, 1, 1], [0], [0]>} : vector<8x8x8xf32>, vector<8x8x8xf32>, vector<8x8x8xf32> -> vector<8x8x8xf32>
    "tpu.trace_stop"() : () -> ()
    %157 = arith.addf %156, %16 : vector<8x8x8xf32>
    %cst_35 = arith.constant dense<0xFF800000> : vector<8x8xf32>
    %158 = vector.multi_reduction <maximumf>, %157, %cst_35 [2] : vector<8x8x8xf32> to vector<8x8xf32>
    %159 = vector.shape_cast %158 : vector<8x8xf32> to vector<8x8x1xf32>
    %160 = vector.broadcast %159 : vector<8x8x1xf32> to vector<8x8x8xf32>
    %161 = arith.subf %157, %160 : vector<8x8x8xf32>
    %162 = math.exp %161 : vector<8x8x8xf32>
    %cst_36 = arith.constant dense<0.000000e+00> : vector<8x8xf32>
    %163 = vector.multi_reduction <add>, %162, %cst_36 [2] : vector<8x8x8xf32> to vector<8x8xf32>
    %164 = vector.shape_cast %163 : vector<8x8xf32> to vector<8x8x1xf32>
    %165 = vector.broadcast %164 : vector<8x8x1xf32> to vector<8x8x8xf32>
    %166 = arith.divf %162, %165 : vector<8x8x8xf32>
    "tpu.trace_start"() <{level = 10 : i32, message = "zqk,zkd->zqd"}> : () -> ()
    %cst_37 = arith.constant dense<0.000000e+00> : vector<8x8x8xf32>
    %167 = tpu.matmul %166, %155, %cst_37 {dimension_numbers = #tpu.dot_dimension_numbers<[2], [1], [1], [2], [0, 0, 0, 1, 1, 2], [0], [0]>} : vector<8x8x8xf32>, vector<8x8x8xf32>, vector<8x8x8xf32> -> vector<8x8x8xf32>
    "tpu.trace_stop"() : () -> ()
    %168 = vector.shape_cast %167 : vector<8x8x8xf32> to vector<4x16x8xf32>
    %169 = vector.extract_strided_slice %168 {offsets = [0, 0, 0], sizes = [1, 16, 8], strides = [1, 1, 1]} : vector<4x16x8xf32> to vector<1x16x8xf32>
    %170 = vector.shape_cast %169 : vector<1x16x8xf32> to vector<16x8xf32>
    %171 = vector.extract_strided_slice %168 {offsets = [1, 0, 0], sizes = [1, 16, 8], strides = [1, 1, 1]} : vector<4x16x8xf32> to vector<1x16x8xf32>
    %172 = vector.shape_cast %171 : vector<1x16x8xf32> to vector<16x8xf32>
    %173 = vector.extract_strided_slice %168 {offsets = [2, 0, 0], sizes = [1, 16, 8], strides = [1, 1, 1]} : vector<4x16x8xf32> to vector<1x16x8xf32>
    %174 = vector.shape_cast %173 : vector<1x16x8xf32> to vector<16x8xf32>
    %175 = vector.extract_strided_slice %168 {offsets = [3, 0, 0], sizes = [1, 16, 8], strides = [1, 1, 1]} : vector<4x16x8xf32> to vector<1x16x8xf32>
    %176 = vector.shape_cast %175 : vector<1x16x8xf32> to vector<16x8xf32>
    %177 = tpu.concatenate %170, %172, %174, %176 in 1 : vector<16x8xf32>, vector<16x8xf32>, vector<16x8xf32>, vector<16x8xf32> -> vector<16x32xf32>
    %c7 = arith.constant 7 : index
    %c0_38 = arith.constant 0 : index
    %c0_39 = arith.constant 0 : index
    %178 = vector.load %arg1[%c7, %c0_38, %c0_39] : memref<13x128x128xf32, #tpu.memory_space<vmem>>, vector<1x32x128xf32>
    %179 = vector.shape_cast %178 : vector<1x32x128xf32> to vector<32x128xf32>
    %cst_40 = arith.constant dense<0.000000e+00> : vector<16x128xf32>
    %180 = tpu.matmul %177, %179, %cst_40 {dimension_numbers = #tpu.dot_dimension_numbers<[1], [0], [0], [1], [0, 0, 1, 1], [], []>} : vector<16x32xf32>, vector<32x128xf32>, vector<16x128xf32> -> vector<16x128xf32>
    %181 = vector.extract_strided_slice %10 {offsets = [7, 0], sizes = [1, 128], strides = [1, 1]} : vector<16x128xf32> to vector<1x128xf32>
    %182 = vector.broadcast %181 : vector<1x128xf32> to vector<16x128xf32>
    %183 = arith.addf %180, %182 : vector<16x128xf32>
    %c8 = arith.constant 8 : index
    %c0_41 = arith.constant 0 : index
    %c0_42 = arith.constant 0 : index
    %184 = vector.load %arg1[%c8, %c0_41, %c0_42] : memref<13x128x128xf32, #tpu.memory_space<vmem>>, vector<1x128x128xf32>
    %185 = vector.shape_cast %184 : vector<1x128x128xf32> to vector<128x128xf32>
    %cst_43 = arith.constant dense<0.000000e+00> : vector<16x128xf32>
    %186 = tpu.matmul %183, %185, %cst_43 {dimension_numbers = #tpu.dot_dimension_numbers<[1], [0], [0], [1], [0, 0, 1, 1], [], []>} : vector<16x128xf32>, vector<128x128xf32>, vector<16x128xf32> -> vector<16x128xf32>
    %187 = vector.extract_strided_slice %10 {offsets = [8, 0], sizes = [1, 128], strides = [1, 1]} : vector<16x128xf32> to vector<1x128xf32>
    %188 = vector.broadcast %187 : vector<1x128xf32> to vector<16x128xf32>
    %189 = arith.addf %186, %188 : vector<16x128xf32>
    %190 = vector.extract_strided_slice %189 {offsets = [0, 64], sizes = [16, 64], strides = [1, 1]} : vector<16x128xf32> to vector<16x64xf32>
    %191 = arith.negf %190 : vector<16x64xf32>
    %192 = math.exp %191 : vector<16x64xf32>
    %cst_44 = arith.constant 1.000000e+00 : f32
    %193 = vector.broadcast %cst_44 : f32 to vector<16x64xf32>
    %194 = arith.addf %193, %192 : vector<16x64xf32>
    %195 = arith.divf %193, %194 : vector<16x64xf32>
    %196 = arith.mulf %190, %195 : vector<16x64xf32>
    %197 = vector.extract_strided_slice %189 {offsets = [0, 0], sizes = [16, 64], strides = [1, 1]} : vector<16x128xf32> to vector<16x64xf32>
    %198 = arith.mulf %196, %197 : vector<16x64xf32>
    %c9 = arith.constant 9 : index
    %c0_45 = arith.constant 0 : index
    %c0_46 = arith.constant 0 : index
    %199 = vector.load %arg1[%c9, %c0_45, %c0_46] : memref<13x128x128xf32, #tpu.memory_space<vmem>>, vector<1x64x128xf32>
    %200 = vector.shape_cast %199 : vector<1x64x128xf32> to vector<64x128xf32>
    %cst_47 = arith.constant dense<0.000000e+00> : vector<16x128xf32>
    %201 = tpu.matmul %198, %200, %cst_47 {dimension_numbers = #tpu.dot_dimension_numbers<[1], [0], [0], [1], [0, 0, 1, 1], [], []>} : vector<16x64xf32>, vector<64x128xf32>, vector<16x128xf32> -> vector<16x128xf32>
    %202 = vector.extract_strided_slice %10 {offsets = [9, 0], sizes = [1, 128], strides = [1, 1]} : vector<16x128xf32> to vector<1x128xf32>
    %203 = vector.broadcast %202 : vector<1x128xf32> to vector<16x128xf32>
    %204 = arith.addf %201, %203 : vector<16x128xf32>
    %c10 = arith.constant 10 : index
    %c0_48 = arith.constant 0 : index
    %c0_49 = arith.constant 0 : index
    %205 = vector.load %arg1[%c10, %c0_48, %c0_49] : memref<13x128x128xf32, #tpu.memory_space<vmem>>, vector<1x128x128xf32>
    %206 = vector.shape_cast %205 : vector<1x128x128xf32> to vector<128x128xf32>
    %cst_50 = arith.constant dense<0.000000e+00> : vector<16x128xf32>
    %207 = tpu.matmul %204, %206, %cst_50 {dimension_numbers = #tpu.dot_dimension_numbers<[1], [0], [0], [1], [0, 0, 1, 1], [], []>} : vector<16x128xf32>, vector<128x128xf32>, vector<16x128xf32> -> vector<16x128xf32>
    %208 = vector.extract_strided_slice %10 {offsets = [10, 0], sizes = [1, 128], strides = [1, 1]} : vector<16x128xf32> to vector<1x128xf32>
    %209 = vector.broadcast %208 : vector<1x128xf32> to vector<16x128xf32>
    %210 = arith.addf %207, %209 : vector<16x128xf32>
    %c0_51 = arith.constant 0 : index
    %c0_52 = arith.constant 0 : index
    %211 = vector.load %arg2[%c0_51, %c0_52] : memref<16x128xf32, #tpu.memory_space<vmem>>, vector<16x128xf32>
    tpu.vector_store %arg2[%c0_51, %c0_52], %210 {strides = array<i32>} : memref<16x128xf32, #tpu.memory_space<vmem>>, vector<16x128xf32>,
    return
  }
}

</mosaic_0001>

<bundles_post_ra>
// kernel: tpu_custom_call.1
= control target key start
LH: loop header
LB: loop body
LE: loop exit
PB: predicated region body
PF: predicated region fallthrough
CT: control target
= control target key end

     0   :  { %7 = vsyncpa [#allocation3], 0  ;;  %s2696_s0 = inlined_call_operand.vmem [shape: s32[16,1], index: 0, kind: input, shape index: {}]   ;;  %s2697_s1 = inlined_call_operand.hbm [shape: f32[13,128,128], index: 1, kind: input, shape index: {}]   ;;  %s2698_s2 = inlined_call_operand.hbm [shape: f32[16,128], index: 2, kind: output, shape index: {}]  }
   0x1   :  { %8 = vsyncpa [#allocation4], 0  ;;  %s15_s11 = sshll.u32 %s2697_s1, 4  ;;  %s2205_s12 = smov [#allocation2]   ;;  %s16_s11 = int_to_ptr.hbm [resolvable:$true] %s15_s11 }
   0x2   :  { %s17_s13 = sshll.u32 %s2205_s12, 4  ;;  %s2206_s14 = smov 128   ;;  %s18_s13 = int_to_ptr.vmem [resolvable:$true] %s17_s13 }
   0x3   :  { %s2207_s15 = smov 8  }
   0x4   :  { %23 = dma.hbm_to_vmem [thread:$0]  %s16_s11, 26624, %s18_s13, [#allocation3], %s2206_s14, %s2206_s14, %s2207_s15  }
   0x5   :  { %2201 = dma.done.wait [#allocation3], 26624  }
   0x6   :  { %2202 = vsyncadd [#allocation3], 4294940672  ;;  %v2208_v0 = vmov 0   ;;  %v28_v1 = vld [vmem:[%s2696_s0] sm:$0xff]  ;;  %v60_v2 = vld [vmem:[#allocation2 + $0x5f8] sm:$0xff]  ;;  %v30_v28 = vlaneseq  ;;  %v2209_v35 = vmov 1.0  }
   0x7   :  { %2041 = vset.pattern.permute.xlu0 %v2208_v0  ;;  %61 = vmatpush.msra.mxu0 %v60_v2  ;;  %v59_v3 = vld [vmem:[#allocation2 + $0x5f0] sm:$0xff]  ;;  %v58_v4 = vld [vmem:[#allocation2 + $0x5e8] sm:$0xff]  ;;  %v57_v5 = vld [vmem:[#allocation2 + $0x5e0] sm:$0xff]  ;;  %s2211_s19 = smov 112   ;;  %s2212_s20 = smov 120   ;;  %vm188_vm2 = vcmask 64512  }
   0x8   :  { %33 = vperm.xlu0 %2041, %v28_v1   ;;  %v29_v6 = vld [vmem:[%s2696_s0 + $0x8] sm:$0xff]  ;;  %v56_v7 = vld [vmem:[#allocation2 + $0x5d8] sm:$0xff]  ;;  %v55_v8 = vld [vmem:[#allocation2 + $0x5d0] sm:$0xff]  ;;  %v2247_v31 = vand.u32 127, %v30_v28  ;;  %s2210_s0 = smov 104   ;;  %s2213_s21 = smov 96  }
   0x9   :  { %62 = vmatpush.msra.mxu0 %v59_v3  ;;  %v54_v9 = vld [vmem:[#allocation2 + $0x5c8] sm:$0xff]  ;;  %v53_v10 = vld [vmem:[#allocation2 + $0x5c0] sm:$0xff]  ;;  %v52_v11 = vld [vmem:[#allocation2 + $0x5b8] sm:$0xff]  ;;  %s2215_s22 = smov 64   ;;  %s2216_s23 = smov 16  }
   0xa   :  { %v51_v12 = vld [vmem:[#allocation2 + $0x5b0] sm:$0xff]  ;;  %v50_v13 = vld [vmem:[#allocation2 + $0x5a8] sm:$0xff]  ;;  %v49_v14 = vld [vmem:[#allocation2 + $0x5a0] sm:$0xff]  ;;  %s2217_s24 = smov 24   ;;  %s2218_s25 = smov [#allocation5]  }
   0xb   :  { %63 = vmatpush.msra.mxu0 %v58_v4  ;;  %v48_v15 = vld [vmem:[#allocation2 + $0x598] sm:$0xff]  ;;  %v47_v16 = vld [vmem:[#allocation2 + $0x590] sm:$0xff]  ;;  %v46_v17 = vld [vmem:[#allocation2 + $0x588] sm:$0xff]  ;;  %s1948_s26 = sshll.u32 %s2218_s25, 4  ;;  %s1950_s29 = sshll.u32 %s2698_s2, 4  ;;  %s1949_s26 = int_to_ptr.vmem [resolvable:$true] %s1948_s26  ;;  %s1951_s29 = int_to_ptr.hbm [resolvable:$true] %s1950_s29 }
   0xc   :  { %v45_v18 = vld [vmem:[#allocation2 + $0x580] sm:$0xff]  ;;  %v106_v19 = vld [vmem:[#allocation2 + $0x78] sm:$0xff]  ;;  %v105_v20 = vld [vmem:[#allocation2 + $0x70] sm:$0xff] }
   0xd   :  { %64 = vmatpush.msra.mxu0 %v57_v5  ;;  %108 = vmatpush.msra.mxu1 %v106_v19  ;;  %v104_v21 = vld [vmem:[#allocation2 + $0x68] sm:$0xff]  ;;  %v103_v22 = vld [vmem:[#allocation2 + $0x60] sm:$0xff]  ;;  %v102_v23 = vld [vmem:[#allocation2 + $0x58] sm:$0xff] }
   0xe   :  { %v101_v24 = vld [vmem:[#allocation2 + $0x50] sm:$0xff]  ;;  %v100_v25 = vld [vmem:[#allocation2 + $0x48] sm:$0xff]  ;;  %v99_v26 = vld [vmem:[#allocation2 + $0x40] sm:$0xff] }
   0xf   :  { %65 = vmatpush.msra.mxu0 %v56_v7  ;;  %109 = vmatpush.msra.mxu1 %v105_v20  ;;  %v98_v27 = vld [vmem:[#allocation2 + $0x38] sm:$0xff]  ;;  %v97_v29 = vld [vmem:[#allocation2 + $0x30] sm:$0xff]  ;;  %v96_v30 = vld [vmem:[#allocation2 + $0x28] sm:$0xff] }
  0x10   :  { %36 = vperm.xlu0 %2041, %v29_v6   ;;  %v95_v32 = vld [vmem:[#allocation2 + $0x20] sm:$0xff]  ;;  %v94_v34 = vld [vmem:[#allocation2 + $0x18] sm:$0xff]  ;;  %v93_v36 = vld [vmem:[#allocation2 + $0x10] sm:$0xff] }
  0x11   :  { %66 = vmatpush.msra.mxu0 %v55_v8  ;;  %110 = vmatpush.msra.mxu1 %v104_v21  ;;  %v92_v37 = vld [vmem:[#allocation2 + $0x8] sm:$0xff]  ;;  %v91_v39 = vld [vmem:[#allocation2] sm:$0xff]  ;;  %v147_v40 = vld [vmem:[#allocation2 + $0xf8] sm:$0xff] }
  0x12   :  { %v146_v41 = vld [vmem:[#allocation2 + $0xf0] sm:$0xff]  ;;  %149 = vmatpush.msra.mxu2 %v147_v40  ;;  %v145_v42 = vld [vmem:[#allocation2 + $0xe8] sm:$0xff]  ;;  %v144_v43 = vld [vmem:[#allocation2 + $0xe0] sm:$0xff] }
  0x13   :  { %67 = vmatpush.msra.mxu0 %v54_v9  ;;  %111 = vmatpush.msra.mxu1 %v103_v22  ;;  %v143_v44 = vld [vmem:[#allocation2 + $0xd8] sm:$0xff]  ;;  %v142_v45 = vld [vmem:[#allocation2 + $0xd0] sm:$0xff]  ;;  %v141_v46 = vld [vmem:[#allocation2 + $0xc8] sm:$0xff] }
  0x14   :  { %150 = vmatpush.msra.mxu2 %v146_v41  ;;  %v140_v47 = vld [vmem:[#allocation2 + $0xc0] sm:$0xff]  ;;  %v139_v48 = vld [vmem:[#allocation2 + $0xb8] sm:$0xff]  ;;  %v138_v49 = vld [vmem:[#allocation2 + $0xb0] sm:$0xff] }
  0x15   :  { %68 = vmatpush.msra.mxu0 %v53_v10  ;;  %112 = vmatpush.msra.mxu1 %v102_v23  ;;  %v137_v50 = vld [vmem:[#allocation2 + $0xa8] sm:$0xff]  ;;  %v136_v51 = vld [vmem:[#allocation2 + $0xa0] sm:$0xff]  ;;  %v135_v52 = vld [vmem:[#allocation2 + $0x98] sm:$0xff] }
  0x16   :  { %151 = vmatpush.msra.mxu2 %v145_v42  ;;  %v134_v54 = vld [vmem:[#allocation2 + $0x90] sm:$0xff]  ;;  %v133_v56 = vld [vmem:[#allocation2 + $0x88] sm:$0xff]  ;;  %v132_v57 = vld [vmem:[#allocation2 + $0x80] sm:$0xff] }
  0x17   :  { %69 = vmatpush.msra.mxu0 %v52_v11  ;;  %113 = vmatpush.msra.mxu1 %v101_v24  ;;  %v2251_v58 = vld [vmem:[#allocation2 + $0x600] sm:$0xff] }
  0x18   :  { %152 = vmatpush.msra.mxu2 %v144_v43  ;;  %v107_v59 = vperm.slane %v2251_v58, 0  ;;  %v148_v0 = vperm.slane %v2251_v58, 1 }
  0x19   :  { %70 = vmatpush.msra.mxu0 %v51_v12  ;;  %114 = vmatpush.msra.mxu1 %v100_v25 }
  0x1a   :  { %153 = vmatpush.msra.mxu2 %v143_v44 }
  0x1b   :  { %71 = vmatpush.msra.mxu0 %v50_v13  ;;  %115 = vmatpush.msra.mxu1 %v99_v26  ;;  %v88_v13 = vshrl.u32 %v30_v28, 7 }
  0x1c   :  { %154 = vmatpush.msra.mxu2 %v142_v45 }
  0x1d   :  { %72 = vmatpush.msra.mxu0 %v49_v14  ;;  %116 = vmatpush.msra.mxu1 %v98_v27  ;;  %vm89_vm3 = vcmp.ge.s32.totalorder %v88_v13, %v2247_v31 }
  0x1e   :  { %155 = vmatpush.msra.mxu2 %v141_v46 }
  0x1f   :  { %73 = vmatpush.msra.mxu0 %v48_v15  ;;  %117 = vmatpush.msra.mxu1 %v97_v29 }
  0x20   :  { %156 = vmatpush.msra.mxu2 %v140_v47 }
  0x21   :  { %74 = vmatpush.msra.mxu0 %v47_v16  ;;  %118 = vmatpush.msra.mxu1 %v96_v30  ;;  %v2214_v16 = vmov -1e+30  }
  0x22   :  { %157 = vmatpush.msra.mxu2 %v139_v48 }
  0x23   :  { %75 = vmatpush.msra.mxu0 %v46_v17  ;;  %119 = vmatpush.msra.mxu1 %v95_v32  ;;  %v2308_v17 = vsel %vm89_vm3, 0.0, %v2214_v16 }
  0x24   :  { %158 = vmatpush.msra.mxu2 %v138_v49 }
  0x25   :  { %76 = vmatpush.msra.mxu0 %v45_v18  ;;  %120 = vmatpush.msra.mxu1 %v94_v34 }
  0x26   :  { %159 = vmatpush.msra.mxu2 %v137_v50 }
  0x27   :  { %121 = vmatpush.msra.mxu1 %v93_v36 }
  0x28   :  { %160 = vmatpush.msra.mxu2 %v136_v51 }
  0x29   :  { %122 = vmatpush.msra.mxu1 %v92_v37 }
  0x2a   :  { %161 = vmatpush.msra.mxu2 %v135_v52 }
  0x2b   :  { %123 = vmatpush.msra.mxu1 %v91_v39 }
  0x2c   :  { %162 = vmatpush.msra.mxu2 %v134_v54 }
  0x2e   :  { %163 = vmatpush.msra.mxu2 %v133_v56 }
  0x30   :  { %164 = vmatpush.msra.mxu2 %v132_v57 }
  0x7a   :  { %v34_v33 = vpop.permute.xlu0 %33 }
  0x7b   :  { %vm38_vm0 = vcmp.eq.s32.totalorder %v34_v33, %v2247_v31 }
  0x7c   :  { %1965 = vmatmul.msk.f32.vlgmr.msra.gmra.mxu0 %vm38_vm0, %v2209_v35 }
  0x82   :  { %v37_v38 = vpop.permute.xlu0 %36 }
  0x83   :  { %vm39_vm1 = vcmp.eq.s32.totalorder %v37_v38, %v2247_v31 }
  0x84   :  { %1966 = vmatmul.msk.f32.gmra.mxu0 %vm39_vm1, %v2209_v35 }
  0xf9   :  { %v78_v53 = vpop.f32.mrf.mxu0 }
  0xfa   :  { %124 = vmatmul.f32.vlgmr.msra.gmra.mxu1 %v78_v53 }
 0x101   :  { %v81_v55 = vpop.f32.mrf.mxu0 }
 0x102   :  { %127 = vmatmul.f32.gmra.mxu1 %v81_v55 }
 0x177   :  { %v125_v60 = vpop.f32.mrf.mxu1 }
 0x178   :  { %v126_v61 = vadd.f32 %v125_v60, %v107_v59 }
 0x17a   :  { %165 = vmatmul.f32.vlgmr.msra.gmra.mxu2 %v126_v61 }
 0x17f   :  { %v128_v62 = vpop.f32.mrf.mxu1 }
 0x180   :  { %v129_v63 = vadd.f32 %v128_v62, %v107_v59 }
 0x182   :  { %168 = vmatmul.f32.gmra.mxu2 %v129_v63 }
 0x1fd   :  { %v166_v1 = vpop.f32.mrf.mxu2 }
 0x1fe   :  { %v2255_v2 = vadd.f32 %v166_v1, %v148_v0 }
 0x200   :  { %182 = vrot.lane.b32.xlu0 %v2255_v2, %s2210_s0  ;;  %178 = vrot.lane.b32.xlu2 %v2255_v2, %s2211_s19 }
 0x201   :  { %174 = vrot.lane.b32.xlu1 %v2255_v2, %s2212_s20 }
 0x205   :  { %v169_v3 = vpop.f32.mrf.mxu2 }
 0x206   :  { %v2263_v4 = vadd.f32 %v169_v3, %v148_v0 }
 0x208   :  { %186 = vrot.lane.b32.xlu2 %v2255_v2, %s2213_s21 }
 0x209   :  { %176 = vrot.lane.b32.xlu1 %v2263_v4, %s2212_s20 }
 0x210   :  { %213 = vrot.lane.b32.xlu2 %v2263_v4, %s2213_s21 }
 0x211   :  { %180 = vrot.lane.b32.xlu1 %v2263_v4, %s2211_s19 }
 0x219   :  { %184 = vrot.lane.b32.xlu1 %v2263_v4, %s2210_s0 }
 0x25a   :  { %v2275_v5 = vpop.permute.xlu2 %178 }
 0x262   :  { %v187_v6 = vpop.permute.xlu2 %186 }
 0x263   :  { %1967 = vmatpush.xpose.msk.msra.mxu3 %vm188_vm2, %v187_v6 }
 0x266   :  { %1968 = vmatmul.msk.f32.vlgmr.msra.gmra.mxu3 %vm188_vm2, %v2255_v2 }
 0x26a   :  { %v214_v7 = vpop.permute.xlu2 %213 }
 0x26b   :  { %1969 = vmatpush.xpose.msk.msrb.mxu3 %vm188_vm2, %v214_v7 }
 0x26e   :  { %1970 = vmatmul.msk.f32.vlgmr.msrb.gmra.mxu3 %vm188_vm2, %v2263_v4 }
 0x272   :  { %v2283_v8 = vpop.permute.xlu0 %182 }
 0x273   :  { %v2285_v9 = vpop.permute.xlu1 %174  ;;  %343 = vrot.lane.b32.xlu1 %v2283_v8, %s2213_s21 }
 0x274   :  { %239 = vrot.lane.b32.xlu0 %v2285_v9, %s2213_s21  ;;  %v2042_v56 = vpack.i.bf16 %v2285_v9, %v2255_v2 }
 0x27b   :  { %v2291_v10 = vpop.permute.xlu1 %176 }
 0x27c   :  { %291 = vrot.lane.b32.xlu0 %v2275_v5, %s2213_s21  ;;  %265 = vrot.lane.b32.xlu2 %v2291_v10, %s2213_s21 }
 0x283   :  { %v2297_v11 = vpop.permute.xlu1 %180 }
 0x284   :  { %317 = vrot.lane.b32.xlu2 %v2297_v11, %s2213_s21 }
 0x28b   :  { %v2301_v12 = vpop.permute.xlu1 %184 }
 0x28c   :  { %369 = vrot.lane.b32.xlu0 %v2301_v12, %s2213_s21 }
 0x2d6   :  { %v266_v18 = vpop.permute.xlu2 %265 }
 0x2de   :  { %v318_v24 = vpop.permute.xlu2 %317 }
 0x2e5   :  { %v344_v14 = vpop.permute.xlu1 %343 }
 0x2e6   :  { %v240_v15 = vpop.permute.xlu0 %239  ;;  %1979 = vmatpush.xpose.msk.msrb.mxu0 %vm188_vm2, %v344_v14 }
 0x2e7   :  { %1971 = vmatpush.xpose.msk.msra.mxu3 %vm188_vm2, %v240_v15 }
 0x2e9   :  { %v210_v19 = vpop.f32.mrf.mxu3  ;;  %1980 = vmatmul.msk.f32.vlgmr.msrb.gmra.mxu0 %vm188_vm2, %v2283_v8 }
 0x2ea   :  { %v211_v20 = vadd.f32 %v210_v19, %v2308_v17  ;;  %1972 = vmatmul.msk.f32.vlgmr.msra.gmra.mxu3 %vm188_vm2, %v2285_v9 }
 0x2eb   :  { %1973 = vmatpush.xpose.msk.msrb.mxu3 %vm188_vm2, %v266_v18 }
 0x2ec   :  { %v395_v21 = vsel %vm188_vm2, %v211_v20, -inf }
 0x2ed   :  { %396 = vmax.xlane.f32.xlu1 %v395_v21 }
 0x2ee   :  { %v292_v22 = vpop.permute.xlu0 %291 }
 0x2ef   :  { %1975 = vmatpush.xpose.msk.msra.mxu3 %vm188_vm2, %v292_v22 }
 0x2f1   :  { %v236_v23 = vpop.f32.mrf.mxu3 }
 0x2f2   :  { %v237_v25 = vadd.f32 %v236_v23, %v2308_v17  ;;  %1974 = vmatmul.msk.f32.vlgmr.msrb.gmra.mxu3 %vm188_vm2, %v2291_v10 }
 0x2f3   :  { %1977 = vmatpush.xpose.msk.msrb.mxu3 %vm188_vm2, %v318_v24 }
 0x2f4   :  { %v398_v26 = vsel %vm188_vm2, %v237_v25, -inf }
 0x2f5   :  { %399 = vmax.xlane.f32.xlu2 %v398_v26 }
 0x2fa   :  { %1976 = vmatmul.msk.f32.vlgmr.msra.gmra.mxu3 %vm188_vm2, %v2275_v5 }
 0x2fe   :  { %v370_v27 = vpop.permute.xlu0 %369 }
 0x2ff   :  { %1981 = vmatpush.xpose.msk.msrb.mxu1 %vm188_vm2, %v370_v27 }
 0x302   :  { %1978 = vmatmul.msk.f32.vlgmr.msrb.gmra.mxu3 %vm188_vm2, %v2297_v11  ;;  %1982 = vmatmul.msk.f32.vlgmr.msrb.gmra.mxu1 %vm188_vm2, %v2301_v12 }
 0x360   :  { %v397_v31 = vpop.xlane.xlu1 %396 }
 0x361   :  { %v419_v34 = vsub.f32 %v211_v20, %v397_v31 }
 0x363   :  { %v427_v36 = vmul.f32 1.442695, %v419_v34 }
 0x365   :  { %2072 = vpow2.f32 %v427_v36 }
 0x366   :  { %v366_v28 = vpop.f32.mrf.mxu0 }
 0x367   :  { %v367_v29 = vadd.f32 %v366_v28, %v2308_v17 }
 0x368   :  { %v400_v37 = vpop.xlane.xlu2 %399 }
 0x369   :  { %v413_v30 = vsel %vm188_vm2, %v367_v29, -inf  ;;  %v420_v40 = vsub.f32 %v237_v25, %v400_v37 }
 0x36a   :  { %414 = vmax.xlane.f32.xlu1 %v413_v30 }
 0x36b   :  { %v429_v42 = vmul.f32 1.442695, %v420_v40  ;;  %v2337_v43 = vpop.eup %2072 }
 0x36c   :  { %v443_v48 = vsel %vm188_vm2, %v2337_v43, 0.0 }
 0x36d   :  { %v262_v32 = vpop.f32.mrf.mxu3  ;;  %2074 = vpow2.f32 %v429_v42 }
 0x36e   :  { %v263_v33 = vadd.f32 %v262_v32, %v2308_v17 }
 0x370   :  { %v401_v35 = vsel %vm188_vm2, %v263_v33, -inf }
 0x371   :  { %402 = vmax.xlane.f32.xlu2 %v401_v35 }
 0x373   :  { %v2345_v51 = vpop.eup %2074 }
 0x374   :  { %v446_v54 = vsel %vm188_vm2, %v2345_v51, 0.0 }
 0x375   :  { %v288_v38 = vpop.f32.mrf.mxu3 }
 0x376   :  { %v289_v39 = vadd.f32 %v288_v38, %v2308_v17 }
 0x378   :  { %v404_v41 = vsel %vm188_vm2, %v289_v39, -inf }
 0x379   :  { %405 = vmax.xlane.f32.xlu2 %v404_v41 }
 0x37d   :  { %v314_v44 = vpop.f32.mrf.mxu3 }
 0x37e   :  { %v315_v45 = vadd.f32 %v314_v44, %v2308_v17  ;;  %v2047_v44 = vpack.i.bf16 %v2263_v4, %v2275_v5 }
 0x37f   :  { %v392_v46 = vpop.f32.mrf.mxu1 }
 0x380   :  { %v393_v47 = vadd.f32 %v392_v46, %v2308_v17  ;;  %v407_v49 = vsel %vm188_vm2, %v315_v45, -inf }
 0x381   :  { %444 = vadd.xlane.f32.xlu2 %v443_v48  ;;  %408 = vmax.xlane.f32.xlu0 %v407_v49  ;;  %v2052_v48 = vpack.i.bf16 %v2297_v11, %v2291_v10 }
 0x382   :  { %v416_v50 = vsel %vm188_vm2, %v393_v47, -inf }
 0x383   :  { %417 = vmax.xlane.f32.xlu1 %v416_v50 }
 0x385   :  { %v340_v52 = vpop.f32.mrf.mxu3 }
 0x386   :  { %v341_v53 = vadd.f32 %v340_v52, %v2308_v17 }
 0x388   :  { %v410_v55 = vsel %vm188_vm2, %v341_v53, -inf }
 0x389   :  { %447 = vadd.xlane.f32.xlu2 %v446_v54  ;;  %411 = vmax.xlane.f32.xlu0 %v410_v55 }
 0x39c   :  { %2043 = vrot.lane.b32.xlu1 %v2042_v56, %s2215_s22 }
 0x3dd   :  { %v415_v57 = vpop.xlane.xlu1 %414 }
 0x3de   :  { %v425_v59 = vsub.f32 %v367_v29, %v415_v57 }
 0x3e0   :  { %v439_v60 = vmul.f32 1.442695, %v425_v59 }
 0x3e2   :  { %2076 = vpow2.f32 %v439_v60 }
 0x3e4   :  { %v403_v61 = vpop.xlane.xlu2 %402 }
 0x3e5   :  { %v421_v62 = vsub.f32 %v263_v33, %v403_v61 }
 0x3e7   :  { %v431_v63 = vmul.f32 1.442695, %v421_v62 }
 0x3e8   :  { %v2354_v0 = vpop.eup %2076 }
 0x3e9   :  { %2078 = vpow2.f32 %v431_v63  ;;  %v461_v1 = vsel %vm188_vm2, %v2354_v0, 0.0 }
 0x3ea   :  { %462 = vadd.xlane.f32.xlu0 %v461_v1 }
 0x3ec   :  { %v406_v3 = vpop.xlane.xlu2 %405 }
 0x3ed   :  { %v422_v6 = vsub.f32 %v289_v39, %v406_v3 }
 0x3ef   :  { %v2358_v2 = vpop.eup %2078  ;;  %v433_v7 = vmul.f32 1.442695, %v422_v6 }
 0x3f0   :  { %v449_v9 = vsel %vm188_vm2, %v2358_v2, 0.0 }
 0x3f1   :  { %2080 = vpow2.f32 %v433_v7 }
 0x3f2   :  { %450 = vadd.xlane.f32.xlu0 %v449_v9 }
 0x3f4   :  { %v445_v13 = vpop.xlane.xlu2 %444  ;;  %v409_v14 = vpop.xlane.xlu0 %408 }
 0x3f5   :  { %2082 = vrcp.f32 %v445_v13  ;;  %v423_v15 = vsub.f32 %v315_v45, %v409_v14  ;;  %v478_v35 = vand.u32 2147483648, %v445_v13  ;;  %vm472_vm5 = vweird.f32 %v445_v13 }
 0x3f6   :  { %v418_v16 = vpop.xlane.xlu1 %417  ;;  %v476_v37 = vand.u32 2147483647, %v445_v13 }
 0x3f7   :  { %v2362_v18 = vpop.eup %2080  ;;  %v426_v19 = vsub.f32 %v393_v47, %v418_v16  ;;  %v435_v20 = vmul.f32 1.442695, %v423_v15  ;;  %v479_v40 = vor.u32 1.1754944e-38, %v478_v35 }
 0x3f8   :  { %v452_v21 = vsel %vm188_vm2, %v2362_v18, 0.0  ;;  %vm477_vm7 = vcmp.eq.f32.partialorder %v476_v37, 8.507059e+37 }
 0x3f9   :  { %v441_v22 = vmul.f32 1.442695, %v426_v19  ;;  %453 = vadd.xlane.f32.xlu2 %v452_v21  ;;  %2084 = vpow2.f32 %v435_v20 }
 0x3fb   :  { %v2083_v23 = vpop.eup %2082  ;;  %2086 = vpow2.f32 %v441_v22 }
 0x3fc   :  { %v468_v24 = vmul.f32 %v2083_v23, %v445_v13  ;;  %v412_v25 = vpop.xlane.xlu0 %411  ;;  %vm473_vm4 = vweird.f32 %v2083_v23  ;;  %v448_v4 = vpop.xlane.xlu2 %447 }
 0x3fd   :  { %v424_v27 = vsub.f32 %v341_v53, %v412_v25  ;;  %vm474_vm6 = vmor %vm472_vm5, %vm473_vm4  ;;  %v493_v55 = vand.u32 2147483648, %v448_v4  ;;  %vm487_vm9 = vweird.f32 %v448_v4  ;;  %v491_v56 = vand.u32 2147483647, %v448_v4 }
 0x3fe   :  { %v469_v26 = vsub.f32 1.0, %v468_v24 }
 0x3ff   :  { %v2366_v28 = vpop.eup %2084  ;;  %v437_v29 = vmul.f32 1.442695, %v424_v27  ;;  %v494_v60 = vor.u32 1.1754944e-38, %v493_v55  ;;  %vm492_vm12 = vcmp.eq.f32.partialorder %v491_v56, 8.507059e+37 }
 0x400   :  { %v455_v31 = vsel %vm188_vm2, %v2366_v28, 0.0  ;;  %v470_v32 = vmul.f32 %v2083_v23, %v469_v26 }
 0x401   :  { %v2368_v30 = vpop.eup %2086  ;;  %2088 = vpow2.f32 %v437_v29  ;;  %456 = vadd.xlane.f32.xlu1 %v455_v31 }
 0x402   :  { %v464_v33 = vsel %vm188_vm2, %v2368_v30, 0.0  ;;  %v471_v34 = vadd.f32 %v2083_v23, %v470_v32  ;;  %2090 = vrcp.f32 %v448_v4 }
 0x403   :  { %465 = vadd.xlane.f32.xlu0 %v464_v33 }
 0x404   :  { %v475_v38 = vsel %vm474_vm6, %v2083_v23, %v471_v34 }
 0x405   :  { %v480_v41 = vsel %vm477_vm7, %v479_v40, %v475_v38 }
 0x406   :  { %v481_v47 = vmul.f32 %v2337_v43, %v480_v41 }
 0x407   :  { %v2374_v36 = vpop.eup %2088 }
 0x408   :  { %v458_v39 = vsel %vm188_vm2, %v2374_v36, 0.0  ;;  %v2091_v5 = vpop.eup %2090 }
 0x409   :  { %v483_v49 = vmul.f32 %v2091_v5, %v448_v4  ;;  %vm488_vm8 = vweird.f32 %v2091_v5 }
 0x40a   :  { %vm489_vm10 = vmor %vm487_vm9, %vm488_vm8 }
 0x40b   :  { %459 = vadd.xlane.f32.xlu0 %v458_v39  ;;  %v484_v50 = vsub.f32 1.0, %v483_v49 }
 0x40d   :  { %v485_v53 = vmul.f32 %v2091_v5, %v484_v50 }
 0x40e   :  { %v2044_v42 = vpop.permute.xlu1 %2043 }
 0x40f   :  { %v2046_v45 = vunpack.i.h.bf16 %v2044_v42  ;;  %v2045_v46 = vunpack.i.l.bf16 %v2044_v42  ;;  %v486_v10 = vadd.f32 %v2091_v5, %v485_v53 }
 0x411   :  { %2048 = vrot.lane.b32.xlu2 %v2047_v44, %s2215_s22  ;;  %608 = vmatpush.msra.mxu0 %v2045_v46  ;;  %v490_v57 = vsel %vm489_vm10, %v2091_v5, %v486_v10 }
 0x412   :  { %1983 = vmatmul.msk.f32.vlgmr.msra.gmra.mxu0 %vm188_vm2, %v481_v47  ;;  %v495_v63 = vsel %vm492_vm12, %v494_v60, %v490_v57 }
 0x413   :  { %660 = vmatpush.msrb.mxu0 %v2046_v45  ;;  %v496_v21 = vmul.f32 %v2345_v51, %v495_v63 }
 0x41a   :  { %2053 = vrot.lane.b32.xlu1 %v2052_v48, %s2215_s22 }
 0x41f   :  { %743 = vrot.lane.b32.xlu0 %v2283_v8, %s2215_s22 }
 0x422   :  { %769 = vrot.lane.b32.xlu1 %v2301_v12, %s2215_s22 }
 0x45d   :  { %v2390_v43 = vpop.xlane.xlu0 %462 }
 0x45e   :  { %v568_v39 = vand.u32 2147483648, %v2390_v43  ;;  %vm562_vm7 = vweird.f32 %v2390_v43  ;;  %v566_v50 = vand.u32 2147483647, %v2390_v43 }
 0x460   :  { %vm567_vm12 = vcmp.eq.f32.partialorder %v566_v50, 8.507059e+37  ;;  %v867_v50 = vld [vmem:[#allocation2 + $0x198] sm:$0xff] }
 0x465   :  { %v451_v52 = vpop.xlane.xlu0 %450 }
 0x466   :  { %2092 = vrcp.f32 %v451_v52  ;;  %v508_v59 = vand.u32 2147483648, %v451_v52  ;;  %v506_v62 = vand.u32 2147483647, %v451_v52  ;;  %vm502_vm13 = vweird.f32 %v451_v52 }
 0x467   :  { %2094 = vrcp.f32 %v2390_v43 }
 0x468   :  { %v509_v3 = vor.u32 1.1754944e-38, %v508_v59  ;;  %vm507_vm15 = vcmp.eq.f32.partialorder %v506_v62, 8.507059e+37 }
 0x46c   :  { %v2093_v54 = vpop.eup %2092  ;;  %v2392_v11 = vpop.xlane.xlu2 %453 }
 0x46d   :  { %v498_v8 = vmul.f32 %v2093_v54, %v451_v52  ;;  %2096 = vrcp.f32 %v2392_v11  ;;  %vm503_vm11 = vweird.f32 %v2093_v54  ;;  %v2396_v7 = vpop.eup %2094  ;;  %v523_v48 = vand.u32 2147483648, %v2392_v11 }
 0x46e   :  { %vm504_vm14 = vmor %vm502_vm13, %vm503_vm11  ;;  %v558_v22 = vmul.f32 %v2396_v7, %v2390_v43  ;;  %vm563_vm3 = vweird.f32 %v2396_v7  ;;  %vm517_vm9 = vweird.f32 %v2392_v11  ;;  %v521_v52 = vand.u32 2147483647, %v2392_v11 }
 0x46f   :  { %v499_v12 = vsub.f32 1.0, %v498_v8  ;;  %vm2424_vm8 = vmor %vm562_vm7, %vm563_vm3  ;;  %vm824_vm7 = vcmask 195584  }
 0x470   :  { %v559_v26 = vsub.f32 1.0, %v558_v22  ;;  %vm522_vm13 = vcmp.eq.f32.partialorder %v521_v52, 8.507059e+37 }
 0x471   :  { %v500_v61 = vmul.f32 %v2093_v54, %v499_v12  ;;  %v524_v12 = vor.u32 1.1754944e-38, %v523_v48  ;;  %v868_v48 = vld [vmem:[#allocation2 + $0x1a0] sm:$0xff] }
 0x472   :  { %v560_v33 = vmul.f32 %v2396_v7, %v559_v26 }
 0x473   :  { %v501_v1 = vadd.f32 %v2093_v54, %v500_v61  ;;  %v2398_v16 = vpop.eup %2096 }
 0x474   :  { %v2049_v6 = vpop.permute.xlu2 %2048  ;;  %v457_v14 = vpop.xlane.xlu1 %456  ;;  %v513_v24 = vmul.f32 %v2398_v16, %v2392_v11  ;;  %v561_v41 = vadd.f32 %v2396_v7, %v560_v33  ;;  %vm518_vm4 = vweird.f32 %v2398_v16  ;;  %v828_v33 = vld [vmem:[#allocation2 + $0x100] sm:$0xff] }
 0x475   :  { %v505_v9 = vsel %vm504_vm14, %v2093_v54, %v501_v1  ;;  %v2051_v13 = vunpack.i.h.bf16 %v2049_v6  ;;  %v2050_v15 = vunpack.i.l.bf16 %v2049_v6  ;;  %2098 = vrcp.f32 %v457_v14  ;;  %vm519_vm10 = vmor %vm517_vm9, %vm518_vm4 }
 0x476   :  { %v510_v19 = vsel %vm507_vm15, %v509_v3, %v505_v9  ;;  %v2400_v20 = vpop.xlane.xlu0 %465  ;;  %v514_v27 = vsub.f32 1.0, %v513_v24  ;;  %v536_v34 = vand.u32 2147483647, %v457_v14  ;;  %v538_v35 = vand.u32 2147483648, %v457_v14 }
 0x477   :  { %634 = vmatpush.msra.mxu3 %v2051_v13  ;;  %712 = vmatpush.msrb.mxu2 %v2050_v15  ;;  %2100 = vrcp.f32 %v2400_v20  ;;  %v511_v23 = vmul.f32 %v2358_v2, %v510_v19  ;;  %vm532_vm1 = vweird.f32 %v457_v14  ;;  %v569_v54 = vor.u32 1.1754944e-38, %v568_v39  ;;  %v874_v39 = vld [vmem:[#allocation2 + $0x1d0] sm:$0xff] }
 0x478   :  { %1984 = vmatmul.msk.f32.vlgmr.msra.gmra.mxu3 %vm188_vm2, %v496_v21  ;;  %v515_v2 = vmul.f32 %v2398_v16, %v514_v27  ;;  %v539_v42 = vor.u32 1.1754944e-38, %v538_v35  ;;  %vm537_vm6 = vcmp.eq.f32.partialorder %v536_v34, 8.507059e+37  ;;  %v565_v55 = vsel %vm2424_vm8, %v2396_v7, %v561_v41  ;;  %v879_v34 = vld [vmem:[#allocation2 + $0x1f8] sm:$0xff]  ;;  %v878_v35 = vld [vmem:[#allocation2 + $0x1f0] sm:$0xff]  ;;  %v872_v41 = vld [vmem:[#allocation2 + $0x1c0] sm:$0xff] }
 0x479   :  { %1985 = vmatmul.msk.f32.vlgmr.msrb.gmra.mxu0 %vm188_vm2, %v511_v23  ;;  %v570_v57 = vsel %vm567_vm12, %v569_v54, %v565_v55  ;;  %v583_v62 = vand.u32 2147483648, %v2400_v20  ;;  %vm577_vm3 = vweird.f32 %v2400_v20  ;;  %v581_v9 = vand.u32 2147483647, %v2400_v20 }
 0x47a   :  { %v516_v45 = vadd.f32 %v2398_v16, %v515_v2  ;;  %v571_v21 = vmul.f32 %v2354_v0, %v570_v57  ;;  %v877_v2 = vld [vmem:[#allocation2 + $0x1e8] sm:$0xff]  ;;  %vm833_vm8 = vcmask 261120  }
 0x47b   :  { %v2099_v25 = vpop.eup %2098  ;;  %v584_v22 = vor.u32 1.1754944e-38, %v583_v62  ;;  %v880_v62 = vperm.slane %v2251_v58, 3 }
 0x47c   :  { %v528_v51 = vmul.f32 %v2099_v25, %v457_v14  ;;  %vm533_vm0 = vweird.f32 %v2099_v25  ;;  %v520_v8 = vsel %vm519_vm10, %v2398_v16, %v516_v45 }
 0x47d   :  { %v2411_v29 = vpop.eup %2100  ;;  %vm534_vm5 = vmor %vm532_vm1, %vm533_vm0  ;;  %v525_v59 = vsel %vm522_vm13, %v524_v12, %v520_v8  ;;  %v865_v12 = vld [vmem:[#allocation2 + $0x188] sm:$0xff] }
 0x47e   :  { %v460_v31 = vpop.xlane.xlu0 %459  ;;  %v529_v32 = vsub.f32 1.0, %v528_v51  ;;  %v573_v38 = vmul.f32 %v2411_v29, %v2400_v20  ;;  %vm578_vm15 = vweird.f32 %v2411_v29  ;;  %v526_v14 = vmul.f32 %v2362_v18, %v525_v59 }
 0x47f   :  { %2102 = vrcp.f32 %v460_v31  ;;  %v553_v43 = vand.u32 2147483648, %v460_v31  ;;  %vm547_vm14 = vweird.f32 %v460_v31  ;;  %vm579_vm4 = vmor %vm577_vm3, %vm578_vm15 }
 0x480   :  { %v530_v37 = vmul.f32 %v2099_v25, %v529_v32  ;;  %v574_v46 = vsub.f32 1.0, %v573_v38  ;;  %v829_v32 = vld [vmem:[#allocation2 + $0x108] sm:$0xff]  ;;  %v875_v38 = vld [vmem:[#allocation2 + $0x1d8] sm:$0xff] }
 0x481   :  { %v554_v63 = vor.u32 1.1754944e-38, %v553_v43 }
 0x482   :  { %v531_v40 = vadd.f32 %v2099_v25, %v530_v37  ;;  %v575_v56 = vmul.f32 %v2411_v29, %v574_v46  ;;  %v876_v37 = vld [vmem:[#allocation2 + $0x1e0] sm:$0xff]  ;;  %v869_v46 = vld [vmem:[#allocation2 + $0x1a8] sm:$0xff] }
 0x484   :  { %v535_v47 = vsel %vm534_vm5, %v2099_v25, %v531_v40  ;;  %v576_v61 = vadd.f32 %v2411_v29, %v575_v56  ;;  %vm582_vm5 = vcmp.eq.f32.partialorder %v581_v9, 8.507059e+37  ;;  %v873_v40 = vld [vmem:[#allocation2 + $0x1c8] sm:$0xff] }
 0x485   :  { %v2103_v44 = vpop.eup %2102  ;;  %v540_v5 = vsel %vm537_vm6, %v539_v42, %v535_v47  ;;  %v871_v42 = vld [vmem:[#allocation2 + $0x1b8] sm:$0xff]  ;;  %vm821_vm6 = vcmask 130048  }
 0x486   :  { %v543_v4 = vmul.f32 %v2103_v44, %v460_v31  ;;  %v541_v53 = vmul.f32 %v2366_v28, %v540_v5  ;;  %vm548_vm11 = vweird.f32 %v2103_v44  ;;  %v551_v28 = vand.u32 2147483647, %v460_v31  ;;  %v830_v31 = vld [vmem:[#allocation2 + $0x110] sm:$0xff] }
 0x487   :  { %vm549_vm0 = vmor %vm547_vm14, %vm548_vm11  ;;  %v580_v16 = vsel %vm579_vm4, %v2411_v29, %v576_v61  ;;  %v831_v29 = vld [vmem:[#allocation2 + $0x118] sm:$0xff] }
 0x488   :  { %v544_v10 = vsub.f32 1.0, %v543_v4  ;;  %1987 = vmatmul.msk.f32.vlgmr.msrb.gmra.mxu2 %vm188_vm2, %v541_v53  ;;  %vm552_vm1 = vcmp.eq.f32.partialorder %v551_v28, 8.507059e+37  ;;  %v585_v18 = vsel %vm582_vm5, %v584_v22, %v580_v16  ;;  %v866_v53 = vld [vmem:[#allocation2 + $0x190] sm:$0xff]  ;;  %v832_v28 = vperm.slane %v2251_v58, 2 }
 0x489   :  { %v586_v23 = vmul.f32 %v2368_v30, %v585_v18  ;;  %852 = vmatpush.msra.mxu2 %v831_v29  ;;  %v960_v29 = vld [vmem:[#allocation2 + $0x228] sm:$0xff] }
 0x48a   :  { %v545_v11 = vmul.f32 %v2103_v44, %v544_v10 }
 0x48b   :  { %853 = vmatpush.msra.mxu2 %v830_v31 }
 0x48c   :  { %v546_v60 = vadd.f32 %v2103_v44, %v545_v11  ;;  %v2054_v1 = vpop.permute.xlu1 %2053  ;;  %v864_v11 = vld [vmem:[#allocation2 + $0x180] sm:$0xff] }
 0x48d   :  { %v2056_v6 = vunpack.i.h.bf16 %v2054_v1  ;;  %v2055_v7 = vunpack.i.l.bf16 %v2054_v1  ;;  %854 = vmatpush.msra.mxu2 %v829_v32  ;;  %v959_v32 = vld [vmem:[#allocation2 + $0x220] sm:$0xff] }
 0x48e   :  { %v550_v3 = vsel %vm549_vm0, %v2103_v44, %v546_v60  ;;  %v870_v44 = vld [vmem:[#allocation2 + $0x1b0] sm:$0xff] }
 0x48f   :  { %v555_v13 = vsel %vm552_vm1, %v554_v63, %v550_v3  ;;  %686 = vmatpush.msra.mxu1 %v2055_v7  ;;  %738 = vmatpush.msrb.mxu3 %v2056_v6  ;;  %vm970_vm1 = vcmask 523264  }
 0x490   :  { %v556_v15 = vmul.f32 %v2374_v36, %v555_v13  ;;  %1986 = vmatmul.msk.f32.vlgmr.msra.gmra.mxu1 %vm188_vm2, %v526_v14  ;;  %v610_v36 = vpop.f32.mrf.mxu0  ;;  %855 = vmatpush.msra.mxu2 %v828_v33 }
 0x491   :  { %v744_v19 = vpop.permute.xlu0 %743  ;;  %881 = vmatpush.msra.mxu3 %v879_v34  ;;  %v958_v34 = vld [vmem:[#allocation2 + $0x218] sm:$0xff] }
 0x492   :  { %1988 = vmatmul.msk.f32.vlgmr.msrb.gmra.mxu3 %vm188_vm2, %v556_v15  ;;  %764 = vmatpush.msra.mxu0 %v744_v19 }
 0x493   :  { %1989 = vmatmul.msk.f32.vlgmr.msra.gmra.mxu0 %vm188_vm2, %v571_v21  ;;  %882 = vmatpush.msra.mxu3 %v878_v35  ;;  %v957_v35 = vld [vmem:[#allocation2 + $0x210] sm:$0xff] }
 0x494   :  { %v770_v20 = vpop.permute.xlu1 %769 }
 0x495   :  { %790 = vmatpush.msrb.mxu1 %v770_v20  ;;  %883 = vmatpush.msra.mxu3 %v877_v2 }
 0x497   :  { %884 = vmatpush.msra.mxu3 %v876_v37  ;;  %v956_v37 = vld [vmem:[#allocation2 + $0x208] sm:$0xff] }
 0x498   :  { %1990 = vmatmul.msk.f32.vlgmr.msrb.gmra.mxu1 %vm188_vm2, %v586_v23 }
 0x499   :  { %885 = vmatpush.msra.mxu3 %v875_v38  ;;  %v955_v38 = vld [vmem:[#allocation2 + $0x200] sm:$0xff] }
 0x49b   :  { %886 = vmatpush.msra.mxu3 %v874_v39 }
 0x49d   :  { %887 = vmatpush.msra.mxu3 %v873_v40 }
 0x49f   :  { %888 = vmatpush.msra.mxu3 %v872_v41 }
 0x4a1   :  { %889 = vmatpush.msra.mxu3 %v871_v42 }
 0x4a3   :  { %890 = vmatpush.msra.mxu3 %v870_v44 }
 0x4a5   :  { %891 = vmatpush.msra.mxu3 %v869_v46 }
 0x4a7   :  { %892 = vmatpush.msra.mxu3 %v868_v48 }
 0x4a9   :  { %893 = vmatpush.msra.mxu3 %v867_v50  ;;  %v1012_v50 = vld [vmem:[#allocation2 + $0x2e8] sm:$0xff] }
 0x4ab   :  { %894 = vmatpush.msra.mxu3 %v866_v53  ;;  %v1010_v53 = vld [vmem:[#allocation2 + $0x2d8] sm:$0xff] }
 0x4ad   :  { %895 = vmatpush.msra.mxu3 %v865_v12  ;;  %v1003_v12 = vld [vmem:[#allocation2 + $0x2a0] sm:$0xff] }
 0x4af   :  { %896 = vmatpush.msra.mxu3 %v864_v11  ;;  %v1002_v11 = vld [vmem:[#allocation2 + $0x298] sm:$0xff] }
 0x4f6   :  { %v662_v24 = vpop.f32.mrf.mxu0 }
 0x4f7   :  { %797 = vrot.lane.b32.xlu2 %v662_v24, %s2207_s15 }
 0x4fb   :  { %v636_v0 = vpop.f32.mrf.mxu3 }
 0x50b   :  { %v714_v25 = vpop.f32.mrf.mxu2 }
 0x50c   :  { %805 = vrot.lane.b32.xlu1 %v714_v25, %s2216_s23 }
 0x50d   :  { %v688_v26 = vpop.f32.mrf.mxu1 }
 0x50e   :  { %799 = vrot.lane.b32.xlu2 %v688_v26, %s2207_s15 }
 0x510   :  { %v766_v27 = vpop.f32.mrf.mxu0 }
 0x511   :  { %813 = vrot.lane.b32.xlu0 %v766_v27, %s2217_s24 }
 0x515   :  { %v740_v51 = vpop.f32.mrf.mxu3  ;;  %v792_v30 = vpop.f32.mrf.mxu1 }
 0x516   :  { %807 = vrot.lane.b32.xlu1 %v740_v51, %s2216_s23  ;;  %v962_v51 = vld [vmem:[#allocation2 + $0x238] sm:$0xff] }
 0x517   :  { %983 = vmatpush.msra.mxu1 %v962_v51 }
 0x519   :  { %815 = vrot.lane.b32.xlu0 %v792_v30, %s2217_s24  ;;  %v961_v30 = vld [vmem:[#allocation2 + $0x230] sm:$0xff] }
 0x51a   :  { %984 = vmatpush.msra.mxu1 %v961_v30 }
 0x51c   :  { %985 = vmatpush.msra.mxu1 %v960_v29 }
 0x51e   :  { %986 = vmatpush.msra.mxu1 %v959_v32 }
 0x520   :  { %987 = vmatpush.msra.mxu1 %v958_v34 }
 0x522   :  { %988 = vmatpush.msra.mxu1 %v957_v35 }
 0x524   :  { %989 = vmatpush.msra.mxu1 %v956_v37 }
 0x526   :  { %990 = vmatpush.msra.mxu1 %v955_v38 }
 0x551   :  { %v798_v45 = vpop.permute.xlu2 %797 }
 0x552   :  { %v819_v4 = vsel %vm188_vm2, %v610_v36, %v798_v45 }
 0x568   :  { %v800_v54 = vpop.permute.xlu2 %799 }
 0x569   :  { %v820_v55 = vsel %vm188_vm2, %v636_v0, %v800_v54  ;;  %v1009_v54 = vld [vmem:[#allocation2 + $0x2d0] sm:$0xff] }
 0x57e   :  { %v806_v47 = vpop.permute.xlu1 %805 }
 0x57f   :  { %v822_v5 = vsel %vm821_vm6, %v819_v4, %v806_v47 }
 0x583   :  { %v814_v49 = vpop.permute.xlu0 %813 }
 0x584   :  { %v825_v52 = vsel %vm824_vm7, %v822_v5, %v814_v49  ;;  %v1014_v5 = vld [vmem:[#allocation2 + $0x2f8] sm:$0xff]  ;;  %v1013_v49 = vld [vmem:[#allocation2 + $0x2f0] sm:$0xff] }
 0x585   :  { %1991 = vmatmul.msk.f32.vlgmr.msra.gmra.mxu2 %vm833_vm8, %v825_v52  ;;  %1016 = vmatpush.msrb.mxu1 %v1014_v5  ;;  %v1011_v52 = vld [vmem:[#allocation2 + $0x2e0] sm:$0xff] }
 0x587   :  { %1017 = vmatpush.msrb.mxu1 %v1013_v49 }
 0x588   :  { %v808_v10 = vpop.permute.xlu1 %807 }
 0x589   :  { %v823_v8 = vsel %vm821_vm6, %v820_v55, %v808_v10  ;;  %1018 = vmatpush.msrb.mxu1 %v1012_v50  ;;  %v1008_v10 = vld [vmem:[#allocation2 + $0x2c8] sm:$0xff]  ;;  %v1007_v55 = vld [vmem:[#allocation2 + $0x2c0] sm:$0xff] }
 0x58b   :  { %v816_v56 = vpop.permute.xlu0 %815  ;;  %1019 = vmatpush.msrb.mxu1 %v1011_v52 }
 0x58c   :  { %v826_v43 = vsel %vm824_vm7, %v823_v8, %v816_v56  ;;  %v1006_v8 = vld [vmem:[#allocation2 + $0x2b8] sm:$0xff]  ;;  %v1005_v56 = vld [vmem:[#allocation2 + $0x2b0] sm:$0xff] }
 0x58d   :  { %1992 = vmatmul.msk.f32.gmra.mxu2 %vm833_vm8, %v826_v43  ;;  %1020 = vmatpush.msrb.mxu1 %v1010_v53  ;;  %v1004_v43 = vld [vmem:[#allocation2 + $0x2a8] sm:$0xff] }
 0x58f   :  { %1021 = vmatpush.msrb.mxu1 %v1009_v54 }
 0x591   :  { %1022 = vmatpush.msrb.mxu1 %v1008_v10 }
 0x593   :  { %1023 = vmatpush.msrb.mxu1 %v1007_v55 }
 0x595   :  { %1024 = vmatpush.msrb.mxu1 %v1006_v8 }
 0x597   :  { %1025 = vmatpush.msrb.mxu1 %v1005_v56 }
 0x599   :  { %1026 = vmatpush.msrb.mxu1 %v1004_v43 }
 0x59b   :  { %1027 = vmatpush.msrb.mxu1 %v1003_v12 }
 0x59d   :  { %1028 = vmatpush.msrb.mxu1 %v1002_v11 }
 0x608   :  { %v857_v57 = vpop.f32.mrf.mxu2 }
 0x609   :  { %v858_v59 = vadd.f32 %v857_v57, %v832_v28  ;;  %v1001_v57 = vld [vmem:[#allocation2 + $0x290] sm:$0xff] }
 0x60a   :  { %1029 = vmatpush.msrb.mxu1 %v1001_v57 }
 0x60b   :  { %897 = vmatmul.f32.vlgmr.msra.gmra.mxu3 %v858_v59 }
 0x610   :  { %v860_v60 = vpop.f32.mrf.mxu2 }
 0x611   :  { %v861_v61 = vadd.f32 %v860_v60, %v832_v28  ;;  %v1000_v60 = vld [vmem:[#allocation2 + $0x288] sm:$0xff] }
 0x612   :  { %1030 = vmatpush.msrb.mxu1 %v1000_v60 }
 0x613   :  { %900 = vmatmul.f32.gmra.mxu3 %v861_v61  ;;  %v999_v61 = vld [vmem:[#allocation2 + $0x280] sm:$0xff] }
 0x614   :  { %1031 = vmatpush.msrb.mxu1 %v999_v61 }
 0x68e   :  { %v898_v63 = vpop.f32.mrf.mxu3 }
 0x68f   :  { %v899_v1 = vadd.f32 %v898_v63, %v880_v62  ;;  %v1054_v63 = vld [vmem:[#allocation2 + $0x370] sm:$0xff] }
 0x691   :  { %946 = vrot.lane.b32.xlu2 %v899_v1, %s2215_s22  ;;  %v1993_v7 = vmul.f32 -1.442695, %v899_v1 }
 0x693   :  { %2104 = vpow2.f32 %v1993_v7  ;;  %v1050_v7 = vld [vmem:[#allocation2 + $0x350] sm:$0xff] }
 0x696   :  { %v901_v3 = vpop.f32.mrf.mxu3 }
 0x697   :  { %v902_v6 = vadd.f32 %v901_v3, %v880_v62  ;;  %v1055_v62 = vld [vmem:[#allocation2 + $0x378] sm:$0xff]  ;;  %v1052_v3 = vld [vmem:[#allocation2 + $0x360] sm:$0xff] }
 0x698   :  { %1057 = vmatpush.msrb.mxu2 %v1055_v62 }
 0x699   :  { %948 = vrot.lane.b32.xlu1 %v902_v6, %s2215_s22  ;;  %v2105_v9 = vpop.eup %2104  ;;  %v1994_v19 = vmul.f32 -1.442695, %v902_v6 }
 0x69a   :  { %v910_v13 = vadd.f32 1.0, %v2105_v9  ;;  %1058 = vmatpush.msrb.mxu2 %v1054_v63  ;;  %v1049_v9 = vld [vmem:[#allocation2 + $0x348] sm:$0xff] }
 0x69c   :  { %2106 = vrcp.f32 %v910_v13  ;;  %v923_v22 = vand.u32 2147483648, %v910_v13  ;;  %vm917_vm10 = vweird.f32 %v910_v13  ;;  %v921_v18 = vand.u32 2147483647, %v910_v13 }
 0x69d   :  { %2108 = vpow2.f32 %v1994_v19 }
 0x69e   :  { %v924_v36 = vor.u32 1.1754944e-38, %v923_v22  ;;  %vm922_vm12 = vcmp.eq.f32.partialorder %v921_v18, 8.507059e+37 }
 0x6a2   :  { %v2107_v14 = vpop.eup %2106 }
 0x6a3   :  { %v913_v15 = vmul.f32 %v2107_v14, %v910_v13  ;;  %vm918_vm9 = vweird.f32 %v2107_v14  ;;  %v2109_v20 = vpop.eup %2108  ;;  %v1048_v13 = vld [vmem:[#allocation2 + $0x340] sm:$0xff] }
 0x6a4   :  { %vm919_vm11 = vmor %vm917_vm10, %vm918_vm9  ;;  %v911_v24 = vadd.f32 1.0, %v2109_v20  ;;  %v1043_v20 = vld [vmem:[#allocation2 + $0x318] sm:$0xff] }
 0x6a5   :  { %v914_v16 = vsub.f32 1.0, %v913_v15  ;;  %v1046_v15 = vld [vmem:[#allocation2 + $0x330] sm:$0xff] }
 0x6a6   :  { %2110 = vrcp.f32 %v911_v24  ;;  %v938_v41 = vand.u32 2147483648, %v911_v24  ;;  %vm932_vm14 = vweird.f32 %v911_v24  ;;  %v936_v42 = vand.u32 2147483647, %v911_v24 }
 0x6a7   :  { %v915_v21 = vmul.f32 %v2107_v14, %v914_v16  ;;  %v2476_v16 = vld [vmem:[#allocation2 + $0x600] sm:$0xff] }
 0x6a8   :  { %v939_v45 = vor.u32 1.1754944e-38, %v938_v41  ;;  %vm937_vm0 = vcmp.eq.f32.partialorder %v936_v42, 8.507059e+37  ;;  %v963_v19 = vperm.slane %v2476_v16, 4 }
 0x6a9   :  { %v916_v58 = vadd.f32 %v2107_v14, %v915_v21  ;;  %v1045_v21 = vld [vmem:[#allocation2 + $0x328] sm:$0xff] }
 0x6ab   :  { %v920_v23 = vsel %vm919_vm11, %v2107_v14, %v916_v58  ;;  %v1047_v14 = vld [vmem:[#allocation2 + $0x338] sm:$0xff]  ;;  %v1044_v58 = vld [vmem:[#allocation2 + $0x320] sm:$0xff] }
 0x6ac   :  { %v925_v25 = vsel %vm922_vm12, %v924_v36, %v920_v23  ;;  %v2111_v31 = vpop.eup %2110  ;;  %v1042_v23 = vld [vmem:[#allocation2 + $0x310] sm:$0xff] }
 0x6ad   :  { %v942_v0 = vmul.f32 %v925_v25, %v899_v1  ;;  %v928_v33 = vmul.f32 %v2111_v31, %v911_v24  ;;  %vm933_vm13 = vweird.f32 %v2111_v31  ;;  %v1053_v1 = vld [vmem:[#allocation2 + $0x368] sm:$0xff] }
 0x6ae   :  { %vm934_vm15 = vmor %vm932_vm14, %vm933_vm13  ;;  %1059 = vmatpush.msrb.mxu2 %v1053_v1  ;;  %v1041_v25 = vld [vmem:[#allocation2 + $0x308] sm:$0xff] }
 0x6af   :  { %v929_v2 = vsub.f32 1.0, %v928_v33 }
 0x6b0   :  { %1060 = vmatpush.msrb.mxu2 %v1052_v3 }
 0x6b1   :  { %v930_v39 = vmul.f32 %v2111_v31, %v929_v2 }
 0x6b3   :  { %v931_v40 = vadd.f32 %v2111_v31, %v930_v39 }
 0x6b5   :  { %v935_v44 = vsel %vm934_vm15, %v2111_v31, %v931_v40  ;;  %v1056_v31 = vperm.slane %v2476_v16, 6 }
 0x6b6   :  { %v940_v46 = vsel %vm937_vm0, %v939_v45, %v935_v44 }
 0x6b7   :  { %v943_v47 = vmul.f32 %v940_v46, %v902_v6  ;;  %v1051_v6 = vld [vmem:[#allocation2 + $0x358] sm:$0xff] }
 0x6b8   :  { %1061 = vmatpush.msrb.mxu2 %v1051_v6 }
 0x6ba   :  { %1062 = vmatpush.msrb.mxu2 %v1050_v7 }
 0x6bc   :  { %1063 = vmatpush.msrb.mxu2 %v1049_v9 }
 0x6be   :  { %1064 = vmatpush.msrb.mxu2 %v1048_v13 }
 0x6c0   :  { %1065 = vmatpush.msrb.mxu2 %v1047_v14 }
 0x6c2   :  { %1066 = vmatpush.msrb.mxu2 %v1046_v15 }
 0x6c4   :  { %1067 = vmatpush.msrb.mxu2 %v1045_v21 }
 0x6c6   :  { %1068 = vmatpush.msrb.mxu2 %v1044_v58 }
 0x6c8   :  { %1069 = vmatpush.msrb.mxu2 %v1043_v20 }
 0x6ca   :  { %1070 = vmatpush.msrb.mxu2 %v1042_v23 }
 0x6cc   :  { %1071 = vmatpush.msrb.mxu2 %v1041_v25 }
 0x6eb   :  { %v947_v26 = vpop.permute.xlu2 %946 }
 0x6ec   :  { %v952_v27 = vmul.f32 %v947_v26, %v942_v0  ;;  %v1040_v0 = vld [vmem:[#allocation2 + $0x300] sm:$0xff]  ;;  %v1015_v26 = vperm.slane %v2476_v16, 5 }
 0x6ed   :  { %1072 = vmatpush.msrb.mxu2 %v1040_v0 }
 0x6ee   :  { %966 = vrot.lane.b32.xlu0 %v952_v27, %s2215_s22 }
 0x70b   :  { %v949_v48 = vpop.permute.xlu1 %948 }
 0x70c   :  { %v953_v4 = vmul.f32 %v949_v48, %v943_v47 }
 0x70e   :  { %968 = vrot.lane.b32.xlu2 %v953_v4, %s2215_s22 }
 0x760   :  { %v967_v28 = vpop.permute.xlu0 %966 }
 0x761   :  { %1995 = vmatmul.msk.f32.vlgmr.msra.gmra.mxu1 %vm970_vm1, %v967_v28 }
 0x768   :  { %v969_v59 = vpop.permute.xlu2 %968 }
 0x769   :  { %1996 = vmatmul.msk.f32.gmra.mxu1 %vm970_vm1, %v969_v59 }
 0x7de   :  { %v992_v22 = vpop.f32.mrf.mxu1 }
 0x7df   :  { %v993_v18 = vadd.f32 %v992_v22, %v963_v19 }
 0x7e1   :  { %1032 = vmatmul.f32.vlgmr.msrb.gmra.mxu1 %v993_v18 }
 0x7e6   :  { %v995_v36 = vpop.f32.mrf.mxu1 }
 0x7e7   :  { %v996_v24 = vadd.f32 %v995_v36, %v963_v19 }
 0x7e9   :  { %1035 = vmatmul.f32.gmra.mxu1 %v996_v24 }
 0x85e   :  { %v1033_v27 = vpop.f32.mrf.mxu1 }
 0x85f   :  { %v1034_v51 = vadd.f32 %v1033_v27, %v1015_v26 }
 0x861   :  { %1073 = vmatmul.f32.vlgmr.msrb.gmra.mxu2 %v1034_v51 }
 0x866   :  { %v1036_v30 = vpop.f32.mrf.mxu1 }
 0x867   :  { %v1037_v29 = vadd.f32 %v1036_v30, %v1015_v26 }
 0x869   :  { %1076 = vmatmul.f32.gmra.mxu2 %v1037_v29 }
 0x8e4   :  { %v1074_v32 = vpop.f32.mrf.mxu2 }
 0x8e5   :  { %v2481_v33 = vadd.f32 %v1074_v32, %v1056_v31 }
 0x8e7   :  { %1090 = vrot.lane.b32.xlu0 %v2481_v33, %s2210_s0  ;;  %1082 = vrot.lane.b32.xlu1 %v2481_v33, %s2212_s20 }
 0x8ec   :  { %v1077_v34 = vpop.f32.mrf.mxu2 }
 0x8ed   :  { %v2487_v35 = vadd.f32 %v1077_v34, %v1056_v31 }
 0x8ef   :  { %1088 = vrot.lane.b32.xlu2 %v2487_v35, %s2211_s19  ;;  %1084 = vrot.lane.b32.xlu0 %v2487_v35, %s2212_s20 }
 0x8f0   :  { %1086 = vrot.lane.b32.xlu1 %v2481_v33, %s2211_s19 }
 0x8f7   :  { %1092 = vrot.lane.b32.xlu2 %v2487_v35, %s2210_s0  ;;  %1094 = vrot.lane.b32.xlu0 %v2481_v33, %s2213_s21 }
 0x949   :  { %v2499_v2 = vpop.permute.xlu2 %1088 }
 0x94a   :  { %1224 = vrot.lane.b32.xlu0 %v2499_v2, %s2213_s21 }
 0x951   :  { %v2503_v37 = vpop.permute.xlu2 %1092 }
 0x952   :  { %1276 = vrot.lane.b32.xlu0 %v2503_v37, %s2213_s21 }
 0x959   :  { %v2507_v38 = vpop.permute.xlu0 %1090  ;;  %v2509_v39 = vpop.permute.xlu1 %1082 }
 0x95a   :  { %1250 = vrot.lane.b32.xlu2 %v2507_v38, %s2213_s21  ;;  %1146 = vrot.lane.b32.xlu1 %v2509_v39, %s2213_s21  ;;  %v2062_v14 = vpack.i.bf16 %v2507_v38, %v2487_v35  ;;  %v2057_v22 = vpack.i.bf16 %v2481_v33, %v2509_v39 }
 0x961   :  { %v2515_v40 = vpop.permute.xlu0 %1084 }
 0x962   :  { %v2517_v41 = vpop.permute.xlu1 %1086  ;;  %1120 = vrot.lane.b32.xlu1 %v2487_v35, %s2213_s21 }
 0x963   :  { %1198 = vrot.lane.b32.xlu2 %v2517_v41, %s2213_s21 }
 0x969   :  { %v1095_v42 = vpop.permute.xlu0 %1094 }
 0x96a   :  { %1997 = vmatpush.xpose.msk.msrb.mxu0 %vm188_vm2, %v1095_v42  ;;  %1172 = vrot.lane.b32.xlu1 %v2515_v40, %s2213_s21 }
 0x96d   :  { %1998 = vmatmul.msk.f32.vlgmr.msrb.gmra.mxu0 %vm188_vm2, %v2481_v33 }
 0x9b4   :  { %v1251_v44 = vpop.permute.xlu2 %1250 }
 0x9bc   :  { %v1225_v45 = vpop.permute.xlu0 %1224 }
 0x9bd   :  { %v1199_v46 = vpop.permute.xlu2 %1198  ;;  %2007 = vmatpush.xpose.msk.msra.mxu2 %vm188_vm2, %v1225_v45 }
 0x9be   :  { %2005 = vmatpush.xpose.msk.msra.mxu1 %vm188_vm2, %v1199_v46 }
 0x9c0   :  { %2008 = vmatmul.msk.f32.vlgmr.msra.gmra.mxu2 %vm188_vm2, %v2499_v2 }
 0x9c1   :  { %2006 = vmatmul.msk.f32.vlgmr.msra.gmra.mxu1 %vm188_vm2, %v2517_v41 }
 0x9c4   :  { %v1277_v5 = vpop.permute.xlu0 %1276 }
 0x9cc   :  { %v1147_v47 = vpop.permute.xlu1 %1146 }
 0x9cd   :  { %2001 = vmatpush.xpose.msk.msrb.mxu3 %vm188_vm2, %v1147_v47 }
 0x9d0   :  { %2002 = vmatmul.msk.f32.vlgmr.msrb.gmra.mxu3 %vm188_vm2, %v2509_v39 }
 0x9d1   :  { %2009 = vmatpush.xpose.msk.msra.mxu3 %vm188_vm2, %v1251_v44 }
 0x9d4   :  { %v1121_v48 = vpop.permute.xlu1 %1120 }
 0x9d5   :  { %1999 = vmatpush.xpose.msk.msra.mxu0 %vm188_vm2, %v1121_v48 }
 0x9d8   :  { %2000 = vmatmul.msk.f32.vlgmr.msra.gmra.mxu0 %vm188_vm2, %v2487_v35  ;;  %2010 = vmatmul.msk.f32.vlgmr.msra.gmra.mxu3 %vm188_vm2, %v2507_v38 }
 0x9dc   :  { %v1173_v4 = vpop.permute.xlu1 %1172 }
 0x9dd   :  { %2003 = vmatpush.xpose.msk.msrb.mxu0 %vm188_vm2, %v1173_v4 }
 0x9e0   :  { %2004 = vmatmul.msk.f32.vlgmr.msrb.gmra.mxu0 %vm188_vm2, %v2515_v40 }
 0x9e1   :  { %2011 = vmatpush.xpose.msk.msra.mxu0 %vm188_vm2, %v1277_v5 }
 0x9e8   :  { %2012 = vmatmul.msk.f32.vlgmr.msra.gmra.mxu0 %vm188_vm2, %v2503_v37 }
 0x9ea   :  { %v1117_v49 = vpop.f32.mrf.mxu0 }
 0x9eb   :  { %v1118_v50 = vadd.f32 %v1117_v49, %v2308_v17 }
 0x9ed   :  { %v1302_v52 = vsel %vm188_vm2, %v1118_v50, -inf }
 0x9ee   :  { %1303 = vmax.xlane.f32.xlu1 %v1302_v52 }
 0xa3e   :  { %v1221_v53 = vpop.f32.mrf.mxu1 }
 0xa3f   :  { %v1222_v54 = vadd.f32 %v1221_v53, %v2308_v17 }
 0xa41   :  { %v1314_v10 = vsel %vm188_vm2, %v1222_v54, -inf }
 0xa42   :  { %1315 = vmax.xlane.f32.xlu1 %v1314_v10 }
 0xa43   :  { %v1247_v19 = vpop.f32.mrf.mxu2 }
 0xa44   :  { %v2571_v21 = vadd.f32 %v1247_v19, %v2308_v17 }
 0xa46   :  { %v1317_v58 = vsel %vm188_vm2, %v2571_v21, -inf }
 0xa53   :  { %v1169_v55 = vpop.f32.mrf.mxu3 }
 0xa54   :  { %v1170_v8 = vadd.f32 %v1169_v55, %v2308_v17 }
 0xa55   :  { %v1143_v56 = vpop.f32.mrf.mxu0 }
 0xa56   :  { %v1144_v43 = vadd.f32 %v1143_v56, %v2308_v17  ;;  %v1308_v12 = vsel %vm188_vm2, %v1170_v8, -inf }
 0xa57   :  { %1309 = vmax.xlane.f32.xlu2 %v1308_v12 }
 0xa58   :  { %v1305_v11 = vsel %vm188_vm2, %v1144_v43, -inf }
 0xa59   :  { %1306 = vmax.xlane.f32.xlu0 %v1305_v11 }
 0xa5b   :  { %v1273_v9 = vpop.f32.mrf.mxu3 }
 0xa5c   :  { %v1274_v13 = vadd.f32 %v1273_v9, %v2308_v17 }
 0xa5d   :  { %v1195_v28 = vpop.f32.mrf.mxu0 }
 0xa5e   :  { %v1196_v57 = vadd.f32 %v1195_v28, %v2308_v17  ;;  %v1320_v15 = vsel %vm188_vm2, %v1274_v13, -inf }
 0xa60   :  { %v1311_v59 = vsel %vm188_vm2, %v1196_v57, -inf }
 0xa61   :  { %1312 = vmax.xlane.f32.xlu0 %v1311_v59  ;;  %v1304_v60 = vpop.xlane.xlu1 %1303 }
 0xa62   :  { %v1326_v61 = vsub.f32 %v1118_v50, %v1304_v60 }
 0xa64   :  { %v1334_v62 = vmul.f32 1.442695, %v1326_v61 }
 0xa65   :  { %v1299_v63 = vpop.f32.mrf.mxu0 }
 0xa66   :  { %2112 = vpow2.f32 %v1334_v62  ;;  %v1300_v1 = vadd.f32 %v1299_v63, %v2308_v17 }
 0xa68   :  { %v1323_v3 = vsel %vm188_vm2, %v1300_v1, -inf }
 0xa69   :  { %1324 = vmax.xlane.f32.xlu1 %v1323_v3 }
 0xa6c   :  { %v2561_v6 = vpop.eup %2112 }
 0xa6d   :  { %v1350_v7 = vsel %vm188_vm2, %v2561_v6, 0.0 }
 0xa6e   :  { %1351 = vadd.xlane.f32.xlu2 %v1350_v7 }
 0xa75   :  { %2063 = vrot.lane.b32.xlu0 %v2062_v14, %s2215_s22  ;;  %v2067_v14 = vpack.i.bf16 %v2515_v40, %v2517_v41 }
 0xa76   :  { %1321 = vmax.xlane.f32.xlu2 %v1320_v15 }
 0xa7e   :  { %1318 = vmax.xlane.f32.xlu2 %v1317_v58 }
 0xa96   :  { %2058 = vrot.lane.b32.xlu2 %v2057_v22, %s2215_s22 }
 0xab5   :  { %v1316_v18 = vpop.xlane.xlu1 %1315 }
 0xab6   :  { %v1330_v20 = vsub.f32 %v1222_v54, %v1316_v18 }
 0xab8   :  { %v1342_v23 = vmul.f32 1.442695, %v1330_v20 }
 0xaba   :  { %2114 = vpow2.f32 %v1342_v23 }
 0xac0   :  { %v2578_v36 = vpop.eup %2114 }
 0xac1   :  { %v1362_v24 = vsel %vm188_vm2, %v2578_v36, 0.0 }
 0xac2   :  { %1363 = vadd.xlane.f32.xlu2 %v1362_v24 }
 0xaca   :  { %v1310_v17 = vpop.xlane.xlu2 %1309 }
 0xacb   :  { %v1328_v25 = vsub.f32 %v1170_v8, %v1310_v17 }
 0xacc   :  { %v1307_v0 = vpop.xlane.xlu0 %1306 }
 0xacd   :  { %v1338_v26 = vmul.f32 1.442695, %v1328_v25  ;;  %v1327_v27 = vsub.f32 %v1144_v43, %v1307_v0 }
 0xacf   :  { %2116 = vpow2.f32 %v1338_v26  ;;  %v1336_v51 = vmul.f32 1.442695, %v1327_v27 }
 0xad1   :  { %2118 = vpow2.f32 %v1336_v51 }
 0xad4   :  { %v1313_v30 = vpop.xlane.xlu0 %1312 }
 0xad5   :  { %v2582_v29 = vpop.eup %2116  ;;  %v1329_v31 = vsub.f32 %v1196_v57, %v1313_v30 }
 0xad6   :  { %v1356_v32 = vsel %vm188_vm2, %v2582_v29, 0.0 }
 0xad7   :  { %v2586_v33 = vpop.eup %2118  ;;  %v1340_v34 = vmul.f32 1.442695, %v1329_v31  ;;  %1357 = vadd.xlane.f32.xlu0 %v1356_v32 }
 0xad8   :  { %v1353_v35 = vsel %vm188_vm2, %v2586_v33, 0.0 }
 0xad9   :  { %2120 = vpow2.f32 %v1340_v34  ;;  %1354 = vadd.xlane.f32.xlu1 %v1353_v35 }
 0xada   :  { %1624 = vrot.lane.b32.xlu2 %v2499_v2, %s2215_s22 }
 0xadc   :  { %v1325_v38 = vpop.xlane.xlu1 %1324 }
 0xadd   :  { %v1333_v39 = vsub.f32 %v1300_v1, %v1325_v38 }
 0xadf   :  { %v2592_v42 = vpop.eup %2120  ;;  %v1348_v44 = vmul.f32 1.442695, %v1333_v39 }
 0xae0   :  { %v1359_v45 = vsel %vm188_vm2, %v2592_v42, 0.0 }
 0xae1   :  { %2122 = vpow2.f32 %v1348_v44  ;;  %1360 = vadd.xlane.f32.xlu1 %v1359_v45  ;;  %v1352_v46 = vpop.xlane.xlu2 %1351 }
 0xae2   :  { %2124 = vrcp.f32 %v1352_v46  ;;  %v1385_v56 = vand.u32 2147483648, %v1352_v46  ;;  %vm1379_vm4 = vweird.f32 %v1352_v46  ;;  %v1383_v12 = vand.u32 2147483647, %v1352_v46 }
 0xae4   :  { %v1386_v60 = vor.u32 1.1754944e-38, %v1385_v56  ;;  %vm1384_vm9 = vcmp.eq.f32.partialorder %v1383_v12, 8.507059e+37 }
 0xae7   :  { %v2596_v47 = vpop.eup %2122  ;;  %v2064_v48 = vpop.permute.xlu0 %2063 }
 0xae8   :  { %v2125_v4 = vpop.eup %2124  ;;  %v2065_v5 = vunpack.i.l.bf16 %v2064_v48  ;;  %v1371_v2 = vsel %vm188_vm2, %v2596_v47, 0.0  ;;  %v2066_v3 = vunpack.i.h.bf16 %v2064_v48 }
 0xae9   :  { %v1375_v49 = vmul.f32 %v2125_v4, %v1352_v46  ;;  %v1322_v50 = vpop.xlane.xlu2 %1321  ;;  %1372 = vadd.xlane.f32.xlu1 %v1371_v2  ;;  %vm1380_vm3 = vweird.f32 %v2125_v4 }
 0xaea   :  { %v1332_v52 = vsub.f32 %v1274_v13, %v1322_v50  ;;  %1541 = vmatpush.msrb.mxu2 %v2065_v5  ;;  %vm1381_vm5 = vmor %vm1379_vm4, %vm1380_vm3 }
 0xaeb   :  { %v1376_v53 = vsub.f32 1.0, %v1375_v49 }
 0xaec   :  { %v1346_v54 = vmul.f32 1.442695, %v1332_v52 }
 0xaed   :  { %v1377_v10 = vmul.f32 %v2125_v4, %v1376_v53 }
 0xaee   :  { %2126 = vpow2.f32 %v1346_v54 }
 0xaef   :  { %v1378_v55 = vadd.f32 %v2125_v4, %v1377_v10 }
 0xaf1   :  { %v1319_v8 = vpop.xlane.xlu2 %1318  ;;  %v1382_v57 = vsel %vm1381_vm5, %v2125_v4, %v1378_v55 }
 0xaf2   :  { %v1331_v43 = vsub.f32 %v2571_v21, %v1319_v8  ;;  %v1387_v61 = vsel %vm1384_vm9, %v1386_v60, %v1382_v57  ;;  %v1780_v8 = vld [vmem:[#allocation2 + $0x460] sm:$0xff] }
 0xaf3   :  { %v1388_v7 = vmul.f32 %v2561_v6, %v1387_v61 }
 0xaf4   :  { %v2601_v11 = vpop.eup %2126  ;;  %v1344_v28 = vmul.f32 1.442695, %v1331_v43 }
 0xaf5   :  { %v1368_v59 = vsel %vm188_vm2, %v2601_v11, 0.0 }
 0xaf6   :  { %2128 = vpow2.f32 %v1344_v28  ;;  %1369 = vadd.xlane.f32.xlu0 %v1368_v59 }
 0xaf9   :  { %v2059_v62 = vpop.permute.xlu2 %2058 }
 0xafa   :  { %v2061_v63 = vunpack.i.h.bf16 %v2059_v62  ;;  %v2060_v1 = vunpack.i.l.bf16 %v2059_v62 }
 0xafc   :  { %v2606_v9 = vpop.eup %2128  ;;  %1515 = vmatpush.msrb.mxu1 %v2061_v63  ;;  %1567 = vmatpush.msrb.mxu3 %v2060_v1 }
 0xafd   :  { %2013 = vmatmul.msk.f32.vlgmr.msrb.gmra.mxu1 %vm188_vm2, %v1388_v7  ;;  %v1365_v13 = vsel %vm188_vm2, %v2606_v9, 0.0 }
 0xafe   :  { %1671 = vmatpush.msra.mxu3 %v2066_v3  ;;  %1366 = vadd.xlane.f32.xlu0 %v1365_v13 }
 0xb02   :  { %2068 = vrot.lane.b32.xlu1 %v2067_v14, %s2215_s22 }
 0xb12   :  { %1676 = vrot.lane.b32.xlu0 %v2503_v37, %s2215_s22 }
 0xb35   :  { %v2616_v6 = vpop.xlane.xlu2 %1363 }
 0xb36   :  { %vm1439_vm9 = vweird.f32 %v2616_v6  ;;  %v1445_v10 = vand.u32 2147483648, %v2616_v6  ;;  %v1443_v56 = vand.u32 2147483647, %v2616_v6 }
 0xb38   :  { %v1446_v60 = vor.u32 1.1754944e-38, %v1445_v10  ;;  %v1782_v10 = vld [vmem:[#allocation2 + $0x470] sm:$0xff] }
 0xb3d   :  { %v1625_v15 = vpop.permute.xlu2 %1624 }
 0xb3e   :  { %1645 = vmatpush.msra.mxu2 %v1625_v15 }
 0xb4a   :  { %v1358_v19 = vpop.xlane.xlu0 %1357 }
 0xb4b   :  { %2130 = vrcp.f32 %v1358_v19  ;;  %v1415_v40 = vand.u32 2147483648, %v1358_v19  ;;  %v1413_v37 = vand.u32 2147483647, %v1358_v19  ;;  %vm1409_vm11 = vweird.f32 %v1358_v19 }
 0xb4c   :  { %v1355_v21 = vpop.xlane.xlu1 %1354 }
 0xb4d   :  { %2132 = vrcp.f32 %v1355_v21  ;;  %v1400_v25 = vand.u32 2147483648, %v1355_v21  ;;  %v1398_v27 = vand.u32 2147483647, %v1355_v21  ;;  %v1416_v51 = vor.u32 1.1754944e-38, %v1415_v40 }
 0xb4e   :  { %2134 = vrcp.f32 %v2616_v6  ;;  %vm1414_vm14 = vcmp.eq.f32.partialorder %v1413_v37, 8.507059e+37  ;;  %vm1394_vm15 = vweird.f32 %v1355_v21 }
 0xb4f   :  { %v1401_v35 = vor.u32 1.1754944e-38, %v1400_v25  ;;  %vm1399_vm3 = vcmp.eq.f32.partialorder %v1398_v27, 8.507059e+37 }
 0xb51   :  { %v2131_v58 = vpop.eup %2130 }
 0xb52   :  { %v1405_v22 = vmul.f32 %v2131_v58, %v1358_v19  ;;  %vm1410_vm10 = vweird.f32 %v2131_v58 }
 0xb53   :  { %v2133_v18 = vpop.eup %2132  ;;  %vm1411_vm13 = vmor %vm1409_vm11, %vm1410_vm10 }
 0xb54   :  { %v1406_v20 = vsub.f32 1.0, %v1405_v22  ;;  %v1390_v23 = vmul.f32 %v2133_v18, %v1355_v21  ;;  %v2618_v24 = vpop.xlane.xlu1 %1360  ;;  %vm1395_vm12 = vweird.f32 %v2133_v18  ;;  %v2135_v32 = vpop.eup %2134 }
 0xb55   :  { %2136 = vrcp.f32 %v2618_v24  ;;  %vm1396_vm0 = vmor %vm1394_vm15, %vm1395_vm12  ;;  %v1435_v48 = vmul.f32 %v2135_v32, %v2616_v6  ;;  %vm1440_vm4 = vweird.f32 %v2135_v32  ;;  %v1430_v55 = vand.u32 2147483648, %v2618_v24 }
 0xb56   :  { %v1407_v41 = vmul.f32 %v2131_v58, %v1406_v20  ;;  %v1391_v17 = vsub.f32 1.0, %v1390_v23  ;;  %vm2636_vm10 = vmor %vm1439_vm9, %vm1440_vm4  ;;  %vm1424_vm11 = vweird.f32 %v2618_v24  ;;  %v1428_v43 = vand.u32 2147483647, %v2618_v24 }
 0xb57   :  { %v1436_v2 = vsub.f32 1.0, %v1435_v48  ;;  %v1431_v61 = vor.u32 1.1754944e-38, %v1430_v55  ;;  %v1781_v55 = vld [vmem:[#allocation2 + $0x468] sm:$0xff] }
 0xb58   :  { %v1408_v0 = vadd.f32 %v2131_v58, %v1407_v41  ;;  %v1392_v26 = vmul.f32 %v2133_v18, %v1391_v17 }
 0xb59   :  { %v1437_v50 = vmul.f32 %v2135_v32, %v1436_v2 }
 0xb5a   :  { %v1412_v30 = vsel %vm1411_vm13, %v2131_v58, %v1408_v0  ;;  %v1393_v31 = vadd.f32 %v2133_v18, %v1392_v26  ;;  %vm1444_vm13 = vcmp.eq.f32.partialorder %v1443_v56, 8.507059e+37  ;;  %v1779_v56 = vld [vmem:[#allocation2 + $0x458] sm:$0xff] }
 0xb5b   :  { %v1417_v34 = vsel %vm1414_vm14, %v1416_v51, %v1412_v30  ;;  %v2137_v44 = vpop.eup %2136  ;;  %vm1429_vm14 = vcmp.eq.f32.partialorder %v1428_v43, 8.507059e+37  ;;  %v1778_v43 = vld [vmem:[#allocation2 + $0x450] sm:$0xff] }
 0xb5c   :  { %v1397_v38 = vsel %vm1396_vm0, %v2133_v18, %v1393_v31  ;;  %v1418_v39 = vmul.f32 %v2582_v29, %v1417_v34  ;;  %v1420_v4 = vmul.f32 %v2137_v44, %v2618_v24  ;;  %v2628_v5 = vpop.xlane.xlu1 %1372  ;;  %vm1425_vm5 = vweird.f32 %v2137_v44 }
 0xb5d   :  { %v1402_v45 = vsel %vm1399_vm3, %v1401_v35, %v1397_v38  ;;  %2138 = vrcp.f32 %v2628_v5  ;;  %vm1426_vm12 = vmor %vm1424_vm11, %vm1425_vm5  ;;  %vm1484_vm9 = vweird.f32 %v2628_v5  ;;  %v1488_v26 = vand.u32 2147483647, %v2628_v5 }
 0xb5e   :  { %2015 = vmatmul.msk.f32.vlgmr.msrb.gmra.mxu3 %vm188_vm2, %v1418_v39  ;;  %v1403_v46 = vmul.f32 %v2586_v33, %v1402_v45  ;;  %v1421_v49 = vsub.f32 1.0, %v1420_v4  ;;  %v1438_v33 = vadd.f32 %v2135_v32, %v1437_v50 }
 0xb60   :  { %2014 = vmatmul.msk.f32.vlgmr.msrb.gmra.mxu2 %vm188_vm2, %v1403_v46  ;;  %v1422_v29 = vmul.f32 %v2137_v44, %v1421_v49  ;;  %v1442_v57 = vsel %vm2636_vm10, %v2135_v32, %v1438_v33  ;;  %v1733_v33 = vld [vmem:[#allocation2 + $0x380] sm:$0xff] }
 0xb61   :  { %v1447_v3 = vsel %vm1444_vm13, %v1446_v60, %v1442_v57  ;;  %vm1489_vm13 = vcmp.eq.f32.partialorder %v1488_v26, 8.507059e+37  ;;  %v1775_v57 = vld [vmem:[#allocation2 + $0x438] sm:$0xff] }
 0xb62   :  { %v1423_v54 = vadd.f32 %v2137_v44, %v1422_v29  ;;  %v1448_v20 = vmul.f32 %v2578_v36, %v1447_v3  ;;  %v1490_v36 = vand.u32 2147483648, %v2628_v5  ;;  %v1736_v29 = vld [vmem:[#allocation2 + $0x398] sm:$0xff] }
 0xb63   :  { %v2631_v53 = vpop.eup %2138 }
 0xb64   :  { %v1480_v12 = vmul.f32 %v2631_v53, %v2628_v5  ;;  %v1427_v59 = vsel %vm1426_vm12, %v2137_v44, %v1423_v54  ;;  %vm1485_vm5 = vweird.f32 %v2631_v53  ;;  %v1491_v32 = vor.u32 1.1754944e-38, %v1490_v36  ;;  %v1783_v54 = vld [vmem:[#allocation2 + $0x478] sm:$0xff] }
 0xb65   :  { %v1432_v7 = vsel %vm1429_vm14, %v1431_v61, %v1427_v59  ;;  %vm1486_vm10 = vmor %vm1484_vm9, %vm1485_vm5  ;;  %1785 = vmatpush.msrb.mxu2 %v1783_v54  ;;  %v1774_v59 = vld [vmem:[#allocation2 + $0x430] sm:$0xff]  ;;  %v1862_v54 = vld [vmem:[#allocation2 + $0x498] sm:$0xff] }
 0xb66   :  { %v1481_v1 = vsub.f32 1.0, %v1480_v12  ;;  %v1433_v18 = vmul.f32 %v2592_v42, %v1432_v7  ;;  %v1777_v12 = vld [vmem:[#allocation2 + $0x448] sm:$0xff] }
 0xb67   :  { %1786 = vmatpush.msrb.mxu2 %v1782_v10  ;;  %v1861_v10 = vld [vmem:[#allocation2 + $0x490] sm:$0xff] }
 0xb68   :  { %v1482_v22 = vmul.f32 %v2631_v53, %v1481_v1  ;;  %v1772_v1 = vld [vmem:[#allocation2 + $0x420] sm:$0xff] }
 0xb69   :  { %v1370_v52 = vpop.xlane.xlu0 %1369  ;;  %1787 = vmatpush.msrb.mxu2 %v1781_v55 }
 0xb6a   :  { %2140 = vrcp.f32 %v1370_v52  ;;  %v1473_v14 = vand.u32 2147483647, %v1370_v52  ;;  %v1475_v6 = vand.u32 2147483648, %v1370_v52  ;;  %vm1469_vm0 = vweird.f32 %v1370_v52 }
 0xb6b   :  { %v1483_v17 = vadd.f32 %v2631_v53, %v1482_v22  ;;  %1788 = vmatpush.msrb.mxu2 %v1780_v8  ;;  %v1860_v8 = vld [vmem:[#allocation2 + $0x488] sm:$0xff] }
 0xb6c   :  { %v1476_v40 = vor.u32 1.1754944e-38, %v1475_v6  ;;  %vm1474_vm4 = vcmp.eq.f32.partialorder %v1473_v14, 8.507059e+37  ;;  %v1771_v14 = vld [vmem:[#allocation2 + $0x418] sm:$0xff]  ;;  %v1770_v6 = vld [vmem:[#allocation2 + $0x410] sm:$0xff] }
 0xb6d   :  { %v1487_v31 = vsel %vm1486_vm10, %v2631_v53, %v1483_v17  ;;  %v1734_v53 = vld [vmem:[#allocation2 + $0x388] sm:$0xff]  ;;  %1789 = vmatpush.msrb.mxu2 %v1779_v56  ;;  %v1859_v56 = vld [vmem:[#allocation2 + $0x480] sm:$0xff] }
 0xb6f   :  { %1790 = vmatpush.msrb.mxu2 %v1778_v43 }
 0xb70   :  { %v2141_v28 = vpop.eup %2140 }
 0xb71   :  { %v1465_v62 = vmul.f32 %v2141_v28, %v1370_v52  ;;  %v1367_v63 = vpop.xlane.xlu0 %1366  ;;  %vm1470_vm15 = vweird.f32 %v2141_v28  ;;  %v1735_v52 = vld [vmem:[#allocation2 + $0x390] sm:$0xff]  ;;  %1791 = vmatpush.msrb.mxu2 %v1777_v12 }
 0xb72   :  { %2142 = vrcp.f32 %v1367_v63  ;;  %vm1471_vm3 = vmor %vm1469_vm0, %vm1470_vm15  ;;  %v1460_v27 = vand.u32 2147483648, %v1367_v63  ;;  %v1458_v30 = vand.u32 2147483647, %v1367_v63  ;;  %vm1454_vm12 = vweird.f32 %v1367_v63 }
 0xb73   :  { %v1466_v13 = vsub.f32 1.0, %v1465_v62  ;;  %v1773_v62 = vld [vmem:[#allocation2 + $0x428] sm:$0xff] }
 0xb74   :  { %v2069_v15 = vpop.permute.xlu1 %2068  ;;  %v1461_v35 = vor.u32 1.1754944e-38, %v1460_v27  ;;  %vm1459_vm15 = vcmp.eq.f32.partialorder %v1458_v30, 8.507059e+37 }
 0xb75   :  { %v1467_v19 = vmul.f32 %v2141_v28, %v1466_v13  ;;  %v2071_v21 = vunpack.i.h.bf16 %v2069_v15  ;;  %v2070_v58 = vunpack.i.l.bf16 %v2069_v15 }
 0xb77   :  { %v1468_v23 = vadd.f32 %v2141_v28, %v1467_v19  ;;  %1593 = vmatpush.msrb.mxu0 %v2071_v21  ;;  %1619 = vmatpush.msra.mxu1 %v2070_v58 }
 0xb78   :  { %v2143_v24 = vpop.eup %2142  ;;  %2016 = vmatmul.msk.f32.vlgmr.msrb.gmra.mxu0 %vm188_vm2, %v1433_v18  ;;  %2017 = vmatmul.msk.f32.vlgmr.msra.gmra.mxu1 %vm188_vm2, %v1448_v20  ;;  %v1769_v20 = vld [vmem:[#allocation2 + $0x408] sm:$0xff] }
 0xb79   :  { %v1472_v41 = vsel %vm1471_vm3, %v2141_v28, %v1468_v23  ;;  %v1450_v37 = vmul.f32 %v2143_v24, %v1367_v63  ;;  %vm1455_vm11 = vweird.f32 %v2143_v24  ;;  %1756 = vmatpush.msrb.mxu1 %v1736_v29  ;;  %v1776_v28 = vld [vmem:[#allocation2 + $0x440] sm:$0xff]  ;;  %v1864_v29 = vld [vmem:[#allocation2 + $0x4a8] sm:$0xff] }
 0xb7a   :  { %v1477_v42 = vsel %vm1474_vm4, %v1476_v40, %v1472_v41  ;;  %vm1456_vm14 = vmor %vm1454_vm12, %vm1455_vm11  ;;  %v1517_v4 = vpop.f32.mrf.mxu1  ;;  %1792 = vmatpush.msrb.mxu2 %v1776_v28  ;;  %v1768_v23 = vld [vmem:[#allocation2 + $0x400] sm:$0xff] }
 0xb7b   :  { %v1451_v25 = vsub.f32 1.0, %v1450_v37  ;;  %v1478_v0 = vmul.f32 %v2601_v11, %v1477_v42  ;;  %v1492_v11 = vsel %vm1489_vm13, %v1491_v32, %v1487_v31  ;;  %1757 = vmatpush.msrb.mxu1 %v1735_v52  ;;  %v2679_v42 = vld [vmem:[#allocation2 + $0x608] sm:$0xff] }
 0xb7c   :  { %v1493_v46 = vmul.f32 %v2596_v47, %v1492_v11  ;;  %1793 = vmatpush.msrb.mxu2 %v1775_v57  ;;  %v1784_v36 = vperm.slane %v2679_v42, 0 }
 0xb7d   :  { %v1452_v51 = vmul.f32 %v2143_v24, %v1451_v25  ;;  %2019 = vmatmul.msk.f32.vlgmr.msra.gmra.mxu3 %vm188_vm2, %v1478_v0  ;;  %1758 = vmatpush.msrb.mxu1 %v1734_v53  ;;  %v1863_v53 = vld [vmem:[#allocation2 + $0x4a0] sm:$0xff] }
 0xb7e   :  { %1794 = vmatpush.msrb.mxu2 %v1774_v59 }
 0xb7f   :  { %v1453_v34 = vadd.f32 %v2143_v24, %v1452_v51  ;;  %1759 = vmatpush.msrb.mxu1 %v1733_v33 }
 0xb80   :  { %1795 = vmatpush.msrb.mxu2 %v1773_v62 }
 0xb81   :  { %v1457_v38 = vsel %vm1456_vm14, %v2143_v24, %v1453_v34  ;;  %v1737_v24 = vperm.slane %v2476_v16, 7 }
 0xb82   :  { %v1462_v39 = vsel %vm1459_vm15, %v1461_v35, %v1457_v38  ;;  %1796 = vmatpush.msrb.mxu2 %v1772_v1 }
 0xb83   :  { %v1463_v44 = vmul.f32 %v2606_v9, %v1462_v39 }
 0xb84   :  { %v1677_v45 = vpop.permute.xlu0 %1676  ;;  %1797 = vmatpush.msrb.mxu2 %v1771_v14  ;;  %v1914_v14 = vld [vmem:[#allocation2 + $0x560] sm:$0xff] }
 0xb85   :  { %2018 = vmatmul.msk.f32.vlgmr.msra.gmra.mxu2 %vm188_vm2, %v1463_v44  ;;  %1697 = vmatpush.msra.mxu0 %v1677_v45 }
 0xb86   :  { %2020 = vmatmul.msk.f32.vlgmr.msra.gmra.mxu0 %vm188_vm2, %v1493_v46  ;;  %1798 = vmatpush.msrb.mxu2 %v1770_v6  ;;  %v1913_v6 = vld [vmem:[#allocation2 + $0x558] sm:$0xff] }
 0xb88   :  { %1799 = vmatpush.msrb.mxu2 %v1769_v20  ;;  %v1906_v20 = vld [vmem:[#allocation2 + $0x520] sm:$0xff] }
 0xb8a   :  { %1800 = vmatpush.msrb.mxu2 %v1768_v23 }
 0xbe1   :  { %v1569_v48 = vpop.f32.mrf.mxu3 }
 0xbe2   :  { %1704 = vrot.lane.b32.xlu2 %v1569_v48, %s2207_s15 }
 0xbe3   :  { %v1543_v49 = vpop.f32.mrf.mxu2 }
 0xbf5   :  { %v1595_v5 = vpop.f32.mrf.mxu0  ;;  %v1621_v2 = vpop.f32.mrf.mxu1 }
 0xbf6   :  { %1706 = vrot.lane.b32.xlu2 %v1595_v5, %s2207_s15  ;;  %1712 = vrot.lane.b32.xlu0 %v1621_v2, %s2216_s23 }
 0xc00   :  { %v1673_v9 = vpop.f32.mrf.mxu3 }
 0xc01   :  { %1720 = vrot.lane.b32.xlu1 %v1673_v9, %s2217_s24 }
 0xc03   :  { %v1699_v47 = vpop.f32.mrf.mxu0 }
 0xc08   :  { %v1647_v50 = vpop.f32.mrf.mxu2 }
 0xc09   :  { %1722 = vrot.lane.b32.xlu1 %v1699_v47, %s2217_s24  ;;  %1714 = vrot.lane.b32.xlu0 %v1647_v50, %s2216_s23  ;;  %v1866_v47 = vld [vmem:[#allocation2 + $0x4b8] sm:$0xff]  ;;  %v1865_v50 = vld [vmem:[#allocation2 + $0x4b0] sm:$0xff] }
 0xc0a   :  { %1886 = vmatpush.msrb.mxu3 %v1866_v47 }
 0xc0c   :  { %1887 = vmatpush.msrb.mxu3 %v1865_v50 }
 0xc0e   :  { %1888 = vmatpush.msrb.mxu3 %v1864_v29 }
 0xc10   :  { %1889 = vmatpush.msrb.mxu3 %v1863_v53 }
 0xc12   :  { %1890 = vmatpush.msrb.mxu3 %v1862_v54 }
 0xc14   :  { %1891 = vmatpush.msrb.mxu3 %v1861_v10 }
 0xc16   :  { %1892 = vmatpush.msrb.mxu3 %v1860_v8 }
 0xc18   :  { %1893 = vmatpush.msrb.mxu3 %v1859_v56 }
 0xc3c   :  { %v1705_v60 = vpop.permute.xlu2 %1704 }
 0xc3d   :  { %v1726_v63 = vsel %vm188_vm2, %v1517_v4, %v1705_v60 }
 0xc50   :  { %v1707_v15 = vpop.permute.xlu2 %1706 }
 0xc51   :  { %v1727_v19 = vsel %vm188_vm2, %v1543_v49, %v1707_v15  ;;  %v1912_v15 = vld [vmem:[#allocation2 + $0x550] sm:$0xff] }
 0xc68   :  { %v1713_v61 = vpop.permute.xlu0 %1712 }
 0xc69   :  { %v1728_v3 = vsel %vm821_vm6, %v1726_v63, %v1713_v61 }
 0xc73   :  { %v1721_v7 = vpop.permute.xlu1 %1720 }
 0xc74   :  { %v1730_v13 = vsel %vm824_vm7, %v1728_v3, %v1721_v7  ;;  %v1917_v3 = vld [vmem:[#allocation2 + $0x578] sm:$0xff]  ;;  %v1916_v7 = vld [vmem:[#allocation2 + $0x570] sm:$0xff] }
 0xc75   :  { %2021 = vmatmul.msk.f32.vlgmr.msrb.gmra.mxu1 %vm833_vm8, %v1730_v13  ;;  %1919 = vmatpush.msrb.mxu0 %v1917_v3  ;;  %v1915_v13 = vld [vmem:[#allocation2 + $0x568] sm:$0xff] }
 0xc77   :  { %1920 = vmatpush.msrb.mxu0 %v1916_v7 }
 0xc79   :  { %1921 = vmatpush.msrb.mxu0 %v1915_v13 }
 0xc7b   :  { %v1723_v21 = vpop.permute.xlu1 %1722  ;;  %v1715_v58 = vpop.permute.xlu0 %1714  ;;  %1922 = vmatpush.msrb.mxu0 %v1914_v14 }
 0xc7c   :  { %v1729_v22 = vsel %vm821_vm6, %v1727_v19, %v1715_v58  ;;  %v1911_v19 = vld [vmem:[#allocation2 + $0x548] sm:$0xff]  ;;  %v1909_v58 = vld [vmem:[#allocation2 + $0x538] sm:$0xff] }
 0xc7d   :  { %v1731_v18 = vsel %vm824_vm7, %v1729_v22, %v1723_v21  ;;  %1923 = vmatpush.msrb.mxu0 %v1913_v6  ;;  %v1910_v21 = vld [vmem:[#allocation2 + $0x540] sm:$0xff]  ;;  %v1908_v22 = vld [vmem:[#allocation2 + $0x530] sm:$0xff] }
 0xc7e   :  { %2022 = vmatmul.msk.f32.gmra.mxu1 %vm833_vm8, %v1731_v18  ;;  %v1907_v18 = vld [vmem:[#allocation2 + $0x528] sm:$0xff] }
 0xc7f   :  { %1924 = vmatpush.msrb.mxu0 %v1912_v15 }
 0xc81   :  { %1925 = vmatpush.msrb.mxu0 %v1911_v19 }
 0xc83   :  { %1926 = vmatpush.msrb.mxu0 %v1910_v21 }
 0xc85   :  { %1927 = vmatpush.msrb.mxu0 %v1909_v58 }
 0xc87   :  { %1928 = vmatpush.msrb.mxu0 %v1908_v22 }
 0xc89   :  { %1929 = vmatpush.msrb.mxu0 %v1907_v18 }
 0xc8b   :  { %1930 = vmatpush.msrb.mxu0 %v1906_v20 }
 0xcf2   :  { %v1761_v40 = vpop.f32.mrf.mxu1 }
 0xcf3   :  { %v1762_v41 = vadd.f32 %v1761_v40, %v1737_v24  ;;  %v1904_v40 = vld [vmem:[#allocation2 + $0x510] sm:$0xff] }
 0xcf5   :  { %1801 = vmatmul.f32.vlgmr.msrb.gmra.mxu2 %v1762_v41 }
 0xcfb   :  { %v1764_v37 = vpop.f32.mrf.mxu1 }
 0xcfc   :  { %v1765_v17 = vadd.f32 %v1764_v37, %v1737_v24  ;;  %v1905_v24 = vld [vmem:[#allocation2 + $0x518] sm:$0xff]  ;;  %v1903_v37 = vld [vmem:[#allocation2 + $0x508] sm:$0xff] }
 0xcfd   :  { %1931 = vmatpush.msrb.mxu0 %v1905_v24 }
 0xcfe   :  { %1804 = vmatmul.f32.gmra.mxu2 %v1765_v17  ;;  %v1902_v17 = vld [vmem:[#allocation2 + $0x500] sm:$0xff] }
 0xcff   :  { %1932 = vmatpush.msrb.mxu0 %v1904_v40 }
 0xd01   :  { %1933 = vmatpush.msrb.mxu0 %v1903_v37 }
 0xd03   :  { %1934 = vmatpush.msrb.mxu0 %v1902_v17 }
 0xd78   :  { %v1802_v25 = vpop.f32.mrf.mxu2 }
 0xd79   :  { %v1803_v0 = vadd.f32 %v1802_v25, %v1784_v36 }
 0xd7b   :  { %1850 = vrot.lane.b32.xlu2 %v1803_v0, %s2215_s22  ;;  %v2023_v51 = vmul.f32 -1.442695, %v1803_v0 }
 0xd7d   :  { %2144 = vpow2.f32 %v2023_v51  ;;  %v1918_v51 = vperm.slane %v2679_v42, 2 }
 0xd81   :  { %v1805_v26 = vpop.f32.mrf.mxu2 }
 0xd82   :  { %v1806_v27 = vadd.f32 %v1805_v26, %v1784_v36  ;;  %v1867_v36 = vperm.slane %v2679_v42, 1 }
 0xd83   :  { %v2145_v16 = vpop.eup %2144 }
 0xd84   :  { %1852 = vrot.lane.b32.xlu0 %v1806_v27, %s2215_s22  ;;  %v1814_v30 = vadd.f32 1.0, %v2145_v16  ;;  %v2024_v35 = vmul.f32 -1.442695, %v1806_v27 }
 0xd86   :  { %2146 = vrcp.f32 %v1814_v30  ;;  %v1827_v39 = vand.u32 2147483648, %v1814_v30  ;;  %vm1821_vm6 = vweird.f32 %v1814_v30  ;;  %v1825_v44 = vand.u32 2147483647, %v1814_v30 }
 0xd87   :  { %2148 = vpow2.f32 %v2024_v35 }
 0xd88   :  { %v1828_v48 = vor.u32 1.1754944e-38, %v1827_v39  ;;  %vm1826_vm8 = vcmp.eq.f32.partialorder %v1825_v44, 8.507059e+37 }
 0xd8c   :  { %v2147_v31 = vpop.eup %2146 }
 0xd8d   :  { %v1817_v32 = vmul.f32 %v2147_v31, %v1814_v30  ;;  %vm1822_vm2 = vweird.f32 %v2147_v31  ;;  %v2149_v46 = vpop.eup %2148 }
 0xd8e   :  { %vm1823_vm7 = vmor %vm1821_vm6, %vm1822_vm2  ;;  %v1815_v5 = vadd.f32 1.0, %v2149_v46 }
 0xd8f   :  { %v1818_v34 = vsub.f32 1.0, %v1817_v32 }
 0xd90   :  { %2150 = vrcp.f32 %v1815_v5  ;;  %v1842_v28 = vand.u32 2147483648, %v1815_v5  ;;  %vm1836_vm3 = vweird.f32 %v1815_v5  ;;  %v1840_v57 = vand.u32 2147483647, %v1815_v5 }
 0xd91   :  { %v1819_v11 = vmul.f32 %v2147_v31, %v1818_v34 }
 0xd92   :  { %v1843_v60 = vor.u32 1.1754944e-38, %v1842_v28  ;;  %vm1841_vm5 = vcmp.eq.f32.partialorder %v1840_v57, 8.507059e+37 }
 0xd93   :  { %v1820_v38 = vadd.f32 %v2147_v31, %v1819_v11 }
 0xd95   :  { %v1824_v45 = vsel %vm1823_vm7, %v2147_v31, %v1820_v38 }
 0xd96   :  { %v1829_v4 = vsel %vm1826_vm8, %v1828_v48, %v1824_v45  ;;  %v2151_v52 = vpop.eup %2150 }
 0xd97   :  { %v1846_v2 = vmul.f32 %v1829_v4, %v1803_v0  ;;  %v1832_v33 = vmul.f32 %v2151_v52, %v1815_v5  ;;  %vm1837_vm0 = vweird.f32 %v2151_v52 }
 0xd98   :  { %vm1838_vm4 = vmor %vm1836_vm3, %vm1837_vm0 }
 0xd99   :  { %v1833_v55 = vsub.f32 1.0, %v1832_v33 }
 0xd9b   :  { %v1834_v43 = vmul.f32 %v2151_v52, %v1833_v55 }
 0xd9d   :  { %v1835_v12 = vadd.f32 %v2151_v52, %v1834_v43 }
 0xd9f   :  { %v1839_v59 = vsel %vm1838_vm4, %v2151_v52, %v1835_v12 }
 0xda0   :  { %v1844_v61 = vsel %vm1841_vm5, %v1843_v60, %v1839_v59 }
 0xda1   :  { %v1847_v62 = vmul.f32 %v1844_v61, %v1806_v27 }
 0xdd5   :  { %v1851_v49 = vpop.permute.xlu2 %1850 }
 0xdd6   :  { %v1856_v9 = vmul.f32 %v1851_v49, %v1846_v2 }
 0xdd8   :  { %1870 = vrot.lane.b32.xlu1 %v1856_v9, %s2215_s22 }
 0xdf6   :  { %v1853_v63 = vpop.permute.xlu0 %1852 }
 0xdf7   :  { %v1857_v1 = vmul.f32 %v1853_v63, %v1847_v62 }
 0xdf9   :  { %1872 = vrot.lane.b32.xlu2 %v1857_v1, %s2215_s22 }
 0xe4a   :  { %v1871_v23 = vpop.permute.xlu1 %1870 }
 0xe4b   :  { %2025 = vmatmul.msk.f32.vlgmr.msrb.gmra.mxu3 %vm970_vm1, %v1871_v23 }
 0xe53   :  { %v1873_v41 = vpop.permute.xlu2 %1872 }
 0xe54   :  { %2026 = vmatmul.msk.f32.gmra.mxu3 %vm970_vm1, %v1873_v41 }
 0xece   :  { %v1895_v25 = vpop.f32.mrf.mxu3 }
 0xecf   :  { %v1896_v0 = vadd.f32 %v1895_v25, %v1867_v36 }
 0xed1   :  { %1935 = vmatmul.f32.vlgmr.msrb.gmra.mxu0 %v1896_v0 }
 0xed7   :  { %v1898_v26 = vpop.f32.mrf.mxu3 }
 0xed8   :  { %v1899_v27 = vadd.f32 %v1898_v26, %v1867_v36 }
 0xeda   :  { %1938 = vmatmul.f32.gmra.mxu0 %v1899_v27 }
 0xf4e   :  { %v1936_v16 = vpop.f32.mrf.mxu0 }
 0xf4f   :  { %v1937_v30 = vadd.f32 %v1936_v16, %v1918_v51 }
 0xf51   :  { %1942 = vst [vmem:[#allocation5] sm:$0xff] %v1937_v30 }
 0xf57   :  { %v1939_v31 = vpop.f32.mrf.mxu0 }
 0xf58   :  { %v1940_v32 = vadd.f32 %v1939_v31, %v1918_v51 }
 0xf5a   :  { %1943 = vst [vmem:[#allocation5 + $0x8] sm:$0xff] %v1940_v32 }
 0xf5b   :  { %1956 = dma.vmem_to_hbm [thread:$0]  %s1949_s26, 256, %s1951_s29, [#allocation4], %s2206_s14, %s2206_s14, %s2207_s15  }
 0xf5c   :  { %2203 = dma.done.wait [#allocation4], 256  }
 0xf5d   :  { %2204 = vsyncadd [#allocation4], 4294967040 }
 0xf5e   :  { %1961 = vsyncpa [#allocation3], 1 }
 0xf5f   :  { %1962 = vsyncpa [#allocation4], 1 }

</bundles_post_ra>
